<compile_context>
chip_gen: v7x
topology: tpu7x:2x2x1
jax: 0.10.0
libtpu: 0.0.40
codegen_flags: <defaults>
</compile_context>

<pallas_src>
import functools

import numpy as np
import jax
import jax.numpy as jnp
from jax.experimental import pallas as pl
from jax.experimental.pallas import tpu as pltpu

EPS = 1e-5          # nn.GroupNorm default eps
GN_GROUPS = 32      # GroupNorm(32, out_channels)


def _round_up(v, m):
    return ((v + m - 1) // m) * m


def _vmem_capacity_bytes():
    """Per-core VMEM capacity; conservative (v7x-sized) fallback."""
    try:
        return int(pltpu.get_tpu_info().vmem_capacity_bytes)
    except Exception:
        return 64 * 1024 * 1024


def _pick_cout_tile(cout, cg, vmem_cap):
    """Cout tile: multiple of the GN group size; prefer 256 on 128-MiB-VMEM
    chips (v5e/v6e), 128 on smaller-VMEM chips (v7x)."""
    cands = (256, 128) if vmem_cap >= 96 * 1024 * 1024 else (128, 256)
    for cand in cands:
        if cout % cand == 0 and cand % cg == 0:
            return cand
    return cout


def _interp_matrix(n_in, n_out):
    """Bilinear (align_corners=True) 1-D interpolation matrix, (n_out, n_in)."""
    R = np.zeros((n_out, n_in), np.float32)
    if n_in == 1:
        R[:, 0] = 1.0
        return jnp.asarray(R)
    src = np.arange(n_out) * (n_in - 1) / (n_out - 1)
    lo = np.clip(np.floor(src).astype(np.int64), 0, n_in - 2)
    frac = (src - lo).astype(np.float32)
    R[np.arange(n_out), lo] += 1.0 - frac
    R[np.arange(n_out), lo + 1] += frac
    return jnp.asarray(R)


def _row_blend_coeffs(n_in):
    """Static (lo, frac) per output row for x2 align_corners bilinear."""
    n_out = 2 * n_in
    src = np.arange(n_out) * (n_in - 1) / (n_out - 1)
    lo = np.clip(np.floor(src).astype(np.int64), 0, n_in - 2)
    frac = (src - lo).astype(np.float64)
    return tuple(int(v) for v in lo), tuple(float(v) for v in frac)


def _block_kernel(x_ref, w_ref, gamma_ref, beta_ref, gmat_ref, rw_ref,
                  out_ref, xpad_ref, *maybe_t,
                  H, W, Wp, Cin, Ct, upsample, fuse_dy, hc, row_lo, row_frac):
    """Fused Conv3x3 + GroupNorm + ReLU (+ bilinear x2) for one (batch, Ct) tile."""
    # ---- in-kernel zero pad: halo only (interior is fully overwritten) ----
    xpad_ref[0:1, :, :] = jnp.zeros((1, Wp, Cin), jnp.bfloat16)
    xpad_ref[H + 1:H + 3, :, :] = jnp.zeros((2, Wp, Cin), jnp.bfloat16)
    xpad_ref[1:H + 1, 0:1, :] = jnp.zeros((H, 1, Cin), jnp.bfloat16)
    xpad_ref[1:H + 1, W + 1:Wp, :] = jnp.zeros((H, Wp - W - 1, Cin), jnp.bfloat16)
    xpad_ref[1:H + 1, 1:W + 1, :] = x_ref[...].astype(jnp.bfloat16)

    xf = xpad_ref[...].reshape((H + 3) * Wp, Cin)        # free: Wp % 8 == 0

    # ---- 3x3 conv via flat offset slices of the padded image -------------
    # dy offsets (0, Wp, 2*Wp) are sublane-aligned views; only dx = 1, 2 need
    # a relayout copy.  Weights are laid out (kw, kh, cin, cout).
    acc = jnp.zeros((H * Wp, Ct), jnp.float32)
    for dx in range(3):
        xs = xf[dx:dx + (H + 2) * Wp, :]                 # dx=0: aligned view
        if fuse_dy:
            # small Cin: one matmul per dx with K = 3*Cin (small concat temp)
            cols = jnp.concatenate(
                [xs[dy * Wp:dy * Wp + H * Wp, :] for dy in range(3)], axis=-1)
            acc = acc + jnp.dot(cols, w_ref[dx * 3 * Cin:(dx + 1) * 3 * Cin, :],
                                preferred_element_type=jnp.float32)
        else:
            # large Cin: 3 matmuls per dx with K = Cin, no concat temp
            for dy in range(3):
                k = dx * 3 + dy
                acc = acc + jnp.dot(xs[dy * Wp:dy * Wp + H * Wp, :],
                                    w_ref[k * Cin:(k + 1) * Cin, :],
                                    preferred_element_type=jnp.float32)

    # Drop the junk columns introduced by the flat-slice trick (W % 8 == 0).
    conv = acc.reshape(H, Wp, Ct)[:, :W, :].reshape(H * W, Ct)   # f32

    # ---- GroupNorm(32, Cout), two-pass variance in f32 --------------------
    # gmat bakes 1/(cg*H*W); groups never straddle the channel tile.
    s = jnp.sum(conv, axis=0, keepdims=True)                        # (1, Ct)
    mean = jnp.dot(s, gmat_ref[...], preferred_element_type=jnp.float32)
    cen = conv - mean
    ss = jnp.sum(cen * cen, axis=0, keepdims=True)                  # (1, Ct)
    var = jnp.dot(ss, gmat_ref[...], preferred_element_type=jnp.float32)
    y = cen * jax.lax.rsqrt(var + EPS) * gamma_ref[...] + beta_ref[...]
    y = jnp.maximum(y, 0.0)                                         # ReLU

    if not upsample:
        out_ref[...] = y.reshape(H, W, Ct).astype(out_ref.dtype)
        return

    # ---- bilinear x2, align_corners=True, separable, bf16 MXU operands ----
    t_ref = maybe_t[0]                                   # (H, 2W, Ct) bf16 scratch
    yb = y.astype(jnp.bfloat16).reshape(H, W, Ct)
    # W direction: chunked batched matmul; broadcast hoisted (loop-invariant).
    rwb = jnp.broadcast_to(rw_ref[...], (hc, 2 * W, W))  # bf16, small chunk
    for h0 in range(0, H, hc):
        tc = jax.lax.dot_general(rwb, yb[h0:h0 + hc, :, :],
                                 (((2,), (1,)), ((0,), (0,))),
                                 preferred_element_type=jnp.float32)
        t_ref[h0:h0 + hc, :, :] = tc.astype(jnp.bfloat16)
    # H direction: static per-output-row blend, written directly to out_ref.
    for i in range(2 * H):
        lo, f = row_lo[i], row_frac[i]
        if f == 0.0:
            out_ref[i, :, :] = t_ref[lo, :, :].astype(out_ref.dtype)
        else:
            r = (t_ref[lo, :, :].astype(jnp.float32) * (1.0 - f)
                 + t_ref[lo + 1, :, :].astype(jnp.float32) * f)
            out_ref[i, :, :] = r.astype(out_ref.dtype)


def conv3x3_gn_relu_block(x_nhwc, w9, gamma, beta, upsample, out_dtype):
    """One Conv3x3GNReLU block. x_nhwc: (N,H,W,Cin); w9: (9*Cin, Cout) bf16,
    laid out (kw, kh, cin, cout)."""
    N, H, W, Cin = x_nhwc.shape
    Cout = w9.shape[-1]
    assert Cout % GN_GROUPS == 0, "GroupNorm(32, C) needs C % 32 == 0"
    assert W % 8 == 0, "kernel assumes W is a multiple of 8 (sublane tiling)"
    cg = Cout // GN_GROUPS
    vmem_cap = _vmem_capacity_bytes()
    ct = _pick_cout_tile(Cout, cg, vmem_cap)
    n_ct = Cout // ct
    Wp = _round_up(W + 2, 8)                      # padded-row pitch (sublane-aligned)
    Ho, Wo = (2 * H, 2 * W) if upsample else (H, W)
    hc = min(8, H)                                # W-upsample row-chunk size
    while H % hc:
        hc -= 1

    # Group-average matrix (scaled by 1/(cg*H*W)); (j, j) diagonal block per tile.
    gid = np.arange(Cout) // cg
    gmat = jnp.asarray(
        (gid[:, None] == gid[None, :]).astype(np.float32) / (cg * H * W))
    rw = _interp_matrix(W, 2 * W).astype(jnp.bfloat16)   # W-direction interp matrix
    if upsample:
        assert H >= 2
        row_lo, row_frac = _row_blend_coeffs(H)          # static H-direction coeffs
    else:
        row_lo, row_frac = (), ()

    kernel = functools.partial(
        _block_kernel, H=H, W=W, Wp=Wp, Cin=Cin, Ct=ct,
        upsample=upsample, fuse_dy=(Cin <= 64), hc=hc,
        row_lo=row_lo, row_frac=row_frac)

    scratch = [pltpu.VMEM((H + 3, Wp, Cin), jnp.bfloat16)]
    if upsample:
        scratch.append(pltpu.VMEM((H, 2 * W, ct), jnp.bfloat16))

    # ~100 MiB on 128-MiB-VMEM chips (v5e/v6e); stays <= 48 MiB on v7x.
    vmem_limit = max(48 * 1024 * 1024,
                     min(vmem_cap - 16 * 1024 * 1024, 100 * 1024 * 1024))

    return pl.pallas_call(
        kernel,
        out_shape=jax.ShapeDtypeStruct((N, Ho, Wo, Cout), out_dtype),
        grid=(N, n_ct),
        in_specs=[
            pl.BlockSpec((None, H, W, Cin), lambda b, j: (b, 0, 0, 0)),
            pl.BlockSpec((9 * Cin, ct), lambda b, j: (0, j)),
            pl.BlockSpec((1, ct), lambda b, j: (0, j)),
            pl.BlockSpec((1, ct), lambda b, j: (0, j)),
            pl.BlockSpec((ct, ct), lambda b, j: (j, j)),
            pl.BlockSpec((2 * W, W), lambda b, j: (0, 0)),
        ],
        out_specs=pl.BlockSpec((None, Ho, Wo, ct), lambda b, j: (b, 0, 0, j)),
        scratch_shapes=scratch,
        compiler_params=pltpu.CompilerParams(
            dimension_semantics=("parallel", "parallel"),
            vmem_limit_bytes=vmem_limit),
    )(x_nhwc.astype(jnp.bfloat16), w9, gamma.reshape(1, Cout),
      beta.reshape(1, Cout), gmat, rw)


def init_segmentation_block(key, in_channels, out_channels, n_upsamples):
    """Deterministic synthetic parameters (conv OIHW weights, GN gamma/beta)."""
    n_blocks = 1 if n_upsamples <= 1 else n_upsamples
    params = []
    cin = in_channels
    for i in range(n_blocks):
        k1, k2, k3, key = jax.random.split(key, 4)
        w = 0.1 * jax.random.normal(k1, (out_channels, cin, 3, 3), jnp.float32)
        gamma = 1.0 + 0.1 * jax.random.normal(k2, (out_channels,), jnp.float32)
        beta = 0.1 * jax.random.normal(k3, (out_channels,), jnp.float32)
        upsample = bool(n_upsamples) if i == 0 else True
        params.append((w, gamma, beta, upsample))
        cin = out_channels
    return params


def segmentation_block_forward(x_nchw, params):
    """SegmentationBlock.forward. Input/output in NCHW (PyTorch convention)."""
    # Cast to bf16 once in the wrapper (conv operands are bf16 anyway).
    y = jnp.transpose(x_nchw, (0, 2, 3, 1)).astype(jnp.bfloat16)   # NCHW -> NHWC
    for i, (w_oihw, gamma, beta, upsample) in enumerate(params):
        cout, cin = w_oihw.shape[0], w_oihw.shape[1]
        # (O,I,KH,KW) -> (KW,KH,I,O): per-dx blocks of 3*Cin rows (dy-major).
        w9 = (jnp.transpose(w_oihw, (3, 2, 1, 0))
              .reshape(9 * cin, cout).astype(jnp.bfloat16))
        # Intermediate activations in bf16 (halves HBM traffic); final in f32.
        out_dtype = jnp.float32 if i == len(params) - 1 else jnp.bfloat16
        y = conv3x3_gn_relu_block(y, w9, gamma, beta, upsample, out_dtype)
    return jnp.transpose(y, (0, 3, 1, 2))                 # NHWC -> NCHW


def _reference_forward(x_nchw, params):
    """Pure-JAX reference (module semantics), mirroring the kernel's dtype
    policy for the conv: bf16 operands with f32 accumulation; GroupNorm, ReLU
    and the bilinear upsample in f32."""
    y = jnp.transpose(x_nchw, (0, 2, 3, 1)).astype(jnp.float32)
    for (w_oihw, gamma, beta, upsample) in params:
        w_hwio = jnp.transpose(w_oihw, (2, 3, 1, 0)).astype(jnp.bfloat16)
        y = jax.lax.conv_general_dilated(
            y.astype(jnp.bfloat16), w_hwio, (1, 1), 'SAME',
            dimension_numbers=('NHWC', 'HWIO', 'NHWC'),
            preferred_element_type=jnp.float32)
        N, H, W, C = y.shape
        cg = C // GN_GROUPS
        yr = y.reshape(N, H, W, GN_GROUPS, cg)
        mean = yr.mean(axis=(1, 2, 4), keepdims=True)
        var = yr.var(axis=(1, 2, 4), keepdims=True)
        yr = (yr - mean) * jax.lax.rsqrt(var + EPS)
        y = yr.reshape(N, H, W, C) * gamma + beta
        y = jnp.maximum(y, 0.0)
        if upsample:
            Rh = _interp_matrix(H, 2 * H)
            Rw = _interp_matrix(W, 2 * W)
            y = jnp.einsum('ih,jw,nhwc->nijc', Rh, Rw, y)
    return jnp.transpose(y, (0, 3, 1, 2))


if __name__ == "__main__":
    key = jax.random.PRNGKey(0)
    kx, kp = jax.random.split(key)

    N, Cin, H, W = 2, 16, 8, 8
    Cout, n_upsamples = 32, 2          # GroupNorm(32, C) => C multiple of 32

    x = jax.random.normal(kx, (N, Cin, H, W), jnp.float32)

    # n_upsamples = 2: two blocks, both with bilinear x2.
    params = init_segmentation_block(kp, Cin, Cout, n_upsamples)
    out = jax.block_until_ready(segmentation_block_forward(x, params))
    ref = jax.block_until_ready(_reference_forward(x, params))
    assert out.shape == (N, Cout, H * 2 ** n_upsamples, W * 2 ** n_upsamples)
    # Tolerance reflects the bf16-operand / f32-accumulate conv and bf16
    # intermediate activation / upsample policy shared by the reference.
    np.testing.assert_allclose(np.asarray(out), np.asarray(ref),
                               rtol=2e-2, atol=2e-2)

    # n_upsamples = 0: single block, no interpolation (exercises that path).
    params0 = init_segmentation_block(kp, Cin, Cout, 0)
    out0 = jax.block_until_ready(segmentation_block_forward(x, params0))
    ref0 = jax.block_until_ready(_reference_forward(x, params0))
    assert out0.shape == (N, Cout, H, W)
    np.testing.assert_allclose(np.asarray(out0), np.asarray(ref0),
                               rtol=2e-2, atol=2e-2)

    print("KERNEL_OK")
</pallas_src>

<mosaic_0001>
module attributes {stable_mosaic.version = 11 : i64} {
  func.func @_block_kernel(%arg0: i32, %arg1: i32, %arg2: memref<1x8x8x16xbf16, #tpu.memory_space<vmem>>, %arg3: memref<144x32xbf16, #tpu.memory_space<vmem>>, %arg4: memref<1x32xf32, #tpu.memory_space<vmem>>, %arg5: memref<1x32xf32, #tpu.memory_space<vmem>>, %arg6: memref<32x32xf32, #tpu.memory_space<vmem>>, %arg7: memref<16x8xbf16, #tpu.memory_space<vmem>>, %arg8: memref<1x16x16x32xbf16, #tpu.memory_space<vmem>>, %arg9: memref<11x16x16xbf16, #tpu.memory_space<vmem>>, %arg10: memref<8x16x32xbf16, #tpu.memory_space<vmem>>) attributes {dimension_semantics = [#tpu.dimension_semantics<parallel>, #tpu.dimension_semantics<parallel>], iteration_bounds = array<i64: 2, 1>, scalar_prefetch = 0 : i64, scratch_operands = 2 : i64, tpu.core_type = #tpu.core_type<tc>, window_params = [{transform_indices = @transform_0, window_bounds = array<i64: 1, 8, 8, 16>}, {transform_indices = @transform_1, window_bounds = array<i64: 144, 32>}, {transform_indices = @transform_2, window_bounds = array<i64: 1, 32>}, {transform_indices = @transform_3, window_bounds = array<i64: 1, 32>}, {transform_indices = @transform_4, window_bounds = array<i64: 32, 32>}, {pipeline_mode = #tpu.pipeline_mode<synchronous>, transform_indices = @transform_5, window_bounds = array<i64: 16, 8>}, {transform_indices = @transform_6, window_bounds = array<i64: 1, 16, 16, 32>}]} {
    %cst = arith.constant 0.000000e+00 : bf16
    %0 = vector.broadcast %cst : bf16 to vector<1x16x16xbf16>
    %c0 = arith.constant 0 : index
    %c0_0 = arith.constant 0 : index
    %c0_1 = arith.constant 0 : index
    %1 = vector.load %arg9[%c0, %c0_0, %c0_1] : memref<11x16x16xbf16, #tpu.memory_space<vmem>>, vector<1x16x16xbf16>
    tpu.vector_store %arg9[%c0, %c0_0, %c0_1], %0 {strides = array<i32>} : memref<11x16x16xbf16, #tpu.memory_space<vmem>>, vector<1x16x16xbf16>,
    %cst_2 = arith.constant 0.000000e+00 : bf16
    %2 = vector.broadcast %cst_2 : bf16 to vector<2x16x16xbf16>
    %c9 = arith.constant 9 : index
    %c0_3 = arith.constant 0 : index
    %c0_4 = arith.constant 0 : index
    %3 = vector.load %arg9[%c9, %c0_3, %c0_4] : memref<11x16x16xbf16, #tpu.memory_space<vmem>>, vector<2x16x16xbf16>
    tpu.vector_store %arg9[%c9, %c0_3, %c0_4], %2 {strides = array<i32>} : memref<11x16x16xbf16, #tpu.memory_space<vmem>>, vector<2x16x16xbf16>,
    %cst_5 = arith.constant 0.000000e+00 : bf16
    %4 = vector.broadcast %cst_5 : bf16 to vector<8x1x16xbf16>
    %c1 = arith.constant 1 : index
    %c0_6 = arith.constant 0 : index
    %c0_7 = arith.constant 0 : index
    %5 = vector.load %arg9[%c1, %c0_6, %c0_7] : memref<11x16x16xbf16, #tpu.memory_space<vmem>>, vector<8x1x16xbf16>
    tpu.vector_store %arg9[%c1, %c0_6, %c0_7], %4 {strides = array<i32>} : memref<11x16x16xbf16, #tpu.memory_space<vmem>>, vector<8x1x16xbf16>,
    %cst_8 = arith.constant 0.000000e+00 : bf16
    %6 = vector.broadcast %cst_8 : bf16 to vector<8x7x16xbf16>
    %c1_9 = arith.constant 1 : index
    %c9_10 = arith.constant 9 : index
    %c0_11 = arith.constant 0 : index
    %7 = vector.load %arg9[%c1_9, %c9_10, %c0_11] : memref<11x16x16xbf16, #tpu.memory_space<vmem>>, vector<8x7x16xbf16>
    tpu.vector_store %arg9[%c1_9, %c9_10, %c0_11], %6 {strides = array<i32>} : memref<11x16x16xbf16, #tpu.memory_space<vmem>>, vector<8x7x16xbf16>,
    %c0_12 = arith.constant 0 : index
    %c0_13 = arith.constant 0 : index
    %c0_14 = arith.constant 0 : index
    %c0_15 = arith.constant 0 : index
    %8 = vector.load %arg2[%c0_12, %c0_13, %c0_14, %c0_15] : memref<1x8x8x16xbf16, #tpu.memory_space<vmem>>, vector<1x8x8x16xbf16>
    %9 = vector.shape_cast %8 : vector<1x8x8x16xbf16> to vector<8x8x16xbf16>
    %c1_16 = arith.constant 1 : index
    %c1_17 = arith.constant 1 : index
    %c0_18 = arith.constant 0 : index
    %10 = vector.load %arg9[%c1_16, %c1_17, %c0_18] : memref<11x16x16xbf16, #tpu.memory_space<vmem>>, vector<8x8x16xbf16>
    tpu.vector_store %arg9[%c1_16, %c1_17, %c0_18], %9 {strides = array<i32>} : memref<11x16x16xbf16, #tpu.memory_space<vmem>>, vector<8x8x16xbf16>,
    %c0_19 = arith.constant 0 : index
    %c0_20 = arith.constant 0 : index
    %c0_21 = arith.constant 0 : index
    %11 = vector.load %arg9[%c0_19, %c0_20, %c0_21] : memref<11x16x16xbf16, #tpu.memory_space<vmem>>, vector<11x16x16xbf16>
    %12 = vector.shape_cast %11 : vector<11x16x16xbf16> to vector<176x16xbf16>
    %cst_22 = arith.constant 0.000000e+00 : f32
    %13 = vector.broadcast %cst_22 : f32 to vector<128x32xf32>
    %14 = vector.extract_strided_slice %12 {offsets = [0, 0], sizes = [160, 16], strides = [1, 1]} : vector<176x16xbf16> to vector<160x16xbf16>
    %15 = vector.extract_strided_slice %14 {offsets = [0, 0], sizes = [128, 16], strides = [1, 1]} : vector<160x16xbf16> to vector<128x16xbf16>
    %16 = vector.extract_strided_slice %14 {offsets = [16, 0], sizes = [128, 16], strides = [1, 1]} : vector<160x16xbf16> to vector<128x16xbf16>
    %17 = vector.extract_strided_slice %14 {offsets = [32, 0], sizes = [128, 16], strides = [1, 1]} : vector<160x16xbf16> to vector<128x16xbf16>
    %18 = tpu.concatenate %15, %16, %17 in 1 : vector<128x16xbf16>, vector<128x16xbf16>, vector<128x16xbf16> -> vector<128x48xbf16>
    %c0_23 = arith.constant 0 : index
    %c0_24 = arith.constant 0 : index
    %19 = vector.load %arg3[%c0_23, %c0_24] : memref<144x32xbf16, #tpu.memory_space<vmem>>, vector<48x32xbf16>
    %cst_25 = arith.constant dense<0.000000e+00> : vector<128x32xf32>
    %20 = tpu.matmul %18, %19, %cst_25 {dimension_numbers = #tpu.dot_dimension_numbers<[1], [0], [0], [1], [0, 0, 1, 1], [], []>} : vector<128x48xbf16>, vector<48x32xbf16>, vector<128x32xf32> -> vector<128x32xf32>
    %21 = arith.addf %13, %20 : vector<128x32xf32>
    %22 = vector.extract_strided_slice %12 {offsets = [1, 0], sizes = [160, 16], strides = [1, 1]} : vector<176x16xbf16> to vector<160x16xbf16>
    %23 = vector.extract_strided_slice %22 {offsets = [0, 0], sizes = [128, 16], strides = [1, 1]} : vector<160x16xbf16> to vector<128x16xbf16>
    %24 = vector.extract_strided_slice %22 {offsets = [16, 0], sizes = [128, 16], strides = [1, 1]} : vector<160x16xbf16> to vector<128x16xbf16>
    %25 = vector.extract_strided_slice %22 {offsets = [32, 0], sizes = [128, 16], strides = [1, 1]} : vector<160x16xbf16> to vector<128x16xbf16>
    %26 = tpu.concatenate %23, %24, %25 in 1 : vector<128x16xbf16>, vector<128x16xbf16>, vector<128x16xbf16> -> vector<128x48xbf16>
    %c48 = arith.constant 48 : index
    %c0_26 = arith.constant 0 : index
    %27 = vector.load %arg3[%c48, %c0_26] : memref<144x32xbf16, #tpu.memory_space<vmem>>, vector<48x32xbf16>
    %cst_27 = arith.constant dense<0.000000e+00> : vector<128x32xf32>
    %28 = tpu.matmul %26, %27, %cst_27 {dimension_numbers = #tpu.dot_dimension_numbers<[1], [0], [0], [1], [0, 0, 1, 1], [], []>} : vector<128x48xbf16>, vector<48x32xbf16>, vector<128x32xf32> -> vector<128x32xf32>
    %29 = arith.addf %21, %28 : vector<128x32xf32>
    %30 = vector.extract_strided_slice %12 {offsets = [2, 0], sizes = [160, 16], strides = [1, 1]} : vector<176x16xbf16> to vector<160x16xbf16>
    %31 = vector.extract_strided_slice %30 {offsets = [0, 0], sizes = [128, 16], strides = [1, 1]} : vector<160x16xbf16> to vector<128x16xbf16>
    %32 = vector.extract_strided_slice %30 {offsets = [16, 0], sizes = [128, 16], strides = [1, 1]} : vector<160x16xbf16> to vector<128x16xbf16>
    %33 = vector.extract_strided_slice %30 {offsets = [32, 0], sizes = [128, 16], strides = [1, 1]} : vector<160x16xbf16> to vector<128x16xbf16>
    %34 = tpu.concatenate %31, %32, %33 in 1 : vector<128x16xbf16>, vector<128x16xbf16>, vector<128x16xbf16> -> vector<128x48xbf16>
    %c96 = arith.constant 96 : index
    %c0_28 = arith.constant 0 : index
    %35 = vector.load %arg3[%c96, %c0_28] : memref<144x32xbf16, #tpu.memory_space<vmem>>, vector<48x32xbf16>
    %cst_29 = arith.constant dense<0.000000e+00> : vector<128x32xf32>
    %36 = tpu.matmul %34, %35, %cst_29 {dimension_numbers = #tpu.dot_dimension_numbers<[1], [0], [0], [1], [0, 0, 1, 1], [], []>} : vector<128x48xbf16>, vector<48x32xbf16>, vector<128x32xf32> -> vector<128x32xf32>
    %37 = arith.addf %29, %36 : vector<128x32xf32>
    %38 = vector.shape_cast %37 : vector<128x32xf32> to vector<8x16x32xf32>
    %39 = vector.extract_strided_slice %38 {offsets = [0, 0, 0], sizes = [8, 8, 32], strides = [1, 1, 1]} : vector<8x16x32xf32> to vector<8x8x32xf32>
    %40 = vector.shape_cast %39 : vector<8x8x32xf32> to vector<64x32xf32>
    %cst_30 = arith.constant dense<0.000000e+00> : vector<32xf32>
    %41 = vector.multi_reduction <add>, %40, %cst_30 [0] : vector<64x32xf32> to vector<32xf32>
    %42 = vector.shape_cast %41 : vector<32xf32> to vector<1x32xf32>
    %c0_31 = arith.constant 0 : index
    %c0_32 = arith.constant 0 : index
    %43 = vector.load %arg6[%c0_31, %c0_32] : memref<32x32xf32, #tpu.memory_space<vmem>>, vector<32x32xf32>
    %cst_33 = arith.constant dense<0.000000e+00> : vector<1x32xf32>
    %44 = tpu.matmul %42, %43, %cst_33 {dimension_numbers = #tpu.dot_dimension_numbers<[1], [0], [0], [1], [0, 0, 1, 1], [], []>} : vector<1x32xf32>, vector<32x32xf32>, vector<1x32xf32> -> vector<1x32xf32>
    %45 = vector.broadcast %44 : vector<1x32xf32> to vector<64x32xf32>
    %46 = arith.subf %40, %45 : vector<64x32xf32>
    %47 = arith.mulf %46, %46 : vector<64x32xf32>
    %cst_34 = arith.constant dense<0.000000e+00> : vector<32xf32>
    %48 = vector.multi_reduction <add>, %47, %cst_34 [0] : vector<64x32xf32> to vector<32xf32>
    %49 = vector.shape_cast %48 : vector<32xf32> to vector<1x32xf32>
    %c0_35 = arith.constant 0 : index
    %c0_36 = arith.constant 0 : index
    %50 = vector.load %arg6[%c0_35, %c0_36] : memref<32x32xf32, #tpu.memory_space<vmem>>, vector<32x32xf32>
    %cst_37 = arith.constant dense<0.000000e+00> : vector<1x32xf32>
    %51 = tpu.matmul %49, %50, %cst_37 {dimension_numbers = #tpu.dot_dimension_numbers<[1], [0], [0], [1], [0, 0, 1, 1], [], []>} : vector<1x32xf32>, vector<32x32xf32>, vector<1x32xf32> -> vector<1x32xf32>
    %cst_38 = arith.constant 9.99999974E-6 : f32
    %52 = vector.broadcast %cst_38 : f32 to vector<1x32xf32>
    %53 = arith.addf %51, %52 : vector<1x32xf32>
    %54 = math.rsqrt %53 : vector<1x32xf32>
    %55 = vector.broadcast %54 : vector<1x32xf32> to vector<64x32xf32>
    %56 = arith.mulf %46, %55 : vector<64x32xf32>
    %c0_39 = arith.constant 0 : index
    %c0_40 = arith.constant 0 : index
    %57 = vector.load %arg4[%c0_39, %c0_40] : memref<1x32xf32, #tpu.memory_space<vmem>>, vector<1x32xf32>
    %58 = vector.broadcast %57 : vector<1x32xf32> to vector<64x32xf32>
    %59 = arith.mulf %56, %58 : vector<64x32xf32>
    %c0_41 = arith.constant 0 : index
    %c0_42 = arith.constant 0 : index
    %60 = vector.load %arg5[%c0_41, %c0_42] : memref<1x32xf32, #tpu.memory_space<vmem>>, vector<1x32xf32>
    %61 = vector.broadcast %60 : vector<1x32xf32> to vector<64x32xf32>
    %62 = arith.addf %59, %61 : vector<64x32xf32>
    %cst_43 = arith.constant 0.000000e+00 : f32
    %63 = vector.broadcast %cst_43 : f32 to vector<64x32xf32>
    %64 = arith.maximumf %62, %63 : vector<64x32xf32>
    %65 = arith.truncf %64 : vector<64x32xf32> to vector<64x32xbf16>
    %66 = vector.shape_cast %65 : vector<64x32xbf16> to vector<8x8x32xbf16>
    %c0_44 = arith.constant 0 : index
    %c0_45 = arith.constant 0 : index
    %67 = vector.load %arg7[%c0_44, %c0_45] : memref<16x8xbf16, #tpu.memory_space<vmem>>, vector<16x8xbf16>
    %68 = vector.shape_cast %67 : vector<16x8xbf16> to vector<1x16x8xbf16>
    %69 = vector.broadcast %68 : vector<1x16x8xbf16> to vector<8x16x8xbf16>
    %cst_46 = arith.constant dense<0.000000e+00> : vector<8x16x32xf32>
    %70 = tpu.matmul %69, %66, %cst_46 {dimension_numbers = #tpu.dot_dimension_numbers<[2], [1], [1], [2], [0, 0, 0, 1, 1, 2], [0], [0]>} : vector<8x16x8xbf16>, vector<8x8x32xbf16>, vector<8x16x32xf32> -> vector<8x16x32xf32>
    %71 = arith.truncf %70 : vector<8x16x32xf32> to vector<8x16x32xbf16>
    %c0_47 = arith.constant 0 : index
    %c0_48 = arith.constant 0 : index
    %c0_49 = arith.constant 0 : index
    %72 = vector.load %arg10[%c0_47, %c0_48, %c0_49] : memref<8x16x32xbf16, #tpu.memory_space<vmem>>, vector<8x16x32xbf16>
    tpu.vector_store %arg10[%c0_47, %c0_48, %c0_49], %71 {strides = array<i32>} : memref<8x16x32xbf16, #tpu.memory_space<vmem>>, vector<8x16x32xbf16>,
    %c0_50 = arith.constant 0 : index
    %c0_51 = arith.constant 0 : index
    %c0_52 = arith.constant 0 : index
    %73 = vector.load %arg10[%c0_50, %c0_51, %c0_52] : memref<8x16x32xbf16, #tpu.memory_space<vmem>>, vector<1x16x32xbf16>
    %74 = vector.shape_cast %73 : vector<1x16x32xbf16> to vector<16x32xbf16>
    %c0_53 = arith.constant 0 : index
    %c0_54 = arith.constant 0 : index
    %c0_55 = arith.constant 0 : index
    %c0_56 = arith.constant 0 : index
    %75 = vector.load %arg8[%c0_53, %c0_54, %c0_55, %c0_56] : memref<1x16x16x32xbf16, #tpu.memory_space<vmem>>, vector<1x1x16x32xbf16>
    %76 = vector.shape_cast %75 : vector<1x1x16x32xbf16> to vector<16x32xbf16>
    %77 = vector.shape_cast %74 : vector<16x32xbf16> to vector<1x1x16x32xbf16>
    tpu.vector_store %arg8[%c0_53, %c0_54, %c0_55, %c0_56], %77 {strides = array<i32>} : memref<1x16x16x32xbf16, #tpu.memory_space<vmem>>, vector<1x1x16x32xbf16>,
    %c0_57 = arith.constant 0 : index
    %c0_58 = arith.constant 0 : index
    %c0_59 = arith.constant 0 : index
    %78 = vector.load %arg10[%c0_57, %c0_58, %c0_59] : memref<8x16x32xbf16, #tpu.memory_space<vmem>>, vector<1x16x32xbf16>
    %79 = vector.shape_cast %78 : vector<1x16x32xbf16> to vector<16x32xbf16>
    %80 = arith.extf %79 : vector<16x32xbf16> to vector<16x32xf32>
    %cst_60 = arith.constant 0.533333361 : f32
    %81 = vector.broadcast %cst_60 : f32 to vector<16x32xf32>
    %82 = arith.mulf %80, %81 : vector<16x32xf32>
    %c1_61 = arith.constant 1 : index
    %c0_62 = arith.constant 0 : index
    %c0_63 = arith.constant 0 : index
    %83 = vector.load %arg10[%c1_61, %c0_62, %c0_63] : memref<8x16x32xbf16, #tpu.memory_space<vmem>>, vector<1x16x32xbf16>
    %84 = vector.shape_cast %83 : vector<1x16x32xbf16> to vector<16x32xbf16>
    %85 = arith.extf %84 : vector<16x32xbf16> to vector<16x32xf32>
    %cst_64 = arith.constant 0.466666669 : f32
    %86 = vector.broadcast %cst_64 : f32 to vector<16x32xf32>
    %87 = arith.mulf %85, %86 : vector<16x32xf32>
    %88 = arith.addf %82, %87 : vector<16x32xf32>
    %89 = arith.truncf %88 : vector<16x32xf32> to vector<16x32xbf16>
    %c0_65 = arith.constant 0 : index
    %c1_66 = arith.constant 1 : index
    %c0_67 = arith.constant 0 : index
    %c0_68 = arith.constant 0 : index
    %90 = vector.load %arg8[%c0_65, %c1_66, %c0_67, %c0_68] : memref<1x16x16x32xbf16, #tpu.memory_space<vmem>>, vector<1x1x16x32xbf16>
    %91 = vector.shape_cast %90 : vector<1x1x16x32xbf16> to vector<16x32xbf16>
    %92 = vector.shape_cast %89 : vector<16x32xbf16> to vector<1x1x16x32xbf16>
    tpu.vector_store %arg8[%c0_65, %c1_66, %c0_67, %c0_68], %92 {strides = array<i32>} : memref<1x16x16x32xbf16, #tpu.memory_space<vmem>>, vector<1x1x16x32xbf16>,
    %c0_69 = arith.constant 0 : index
    %c0_70 = arith.constant 0 : index
    %c0_71 = arith.constant 0 : index
    %93 = vector.load %arg10[%c0_69, %c0_70, %c0_71] : memref<8x16x32xbf16, #tpu.memory_space<vmem>>, vector<1x16x32xbf16>
    %94 = vector.shape_cast %93 : vector<1x16x32xbf16> to vector<16x32xbf16>
    %95 = arith.extf %94 : vector<16x32xbf16> to vector<16x32xf32>
    %cst_72 = arith.constant 0.0666666701 : f32
    %96 = vector.broadcast %cst_72 : f32 to vector<16x32xf32>
    %97 = arith.mulf %95, %96 : vector<16x32xf32>
    %c1_73 = arith.constant 1 : index
    %c0_74 = arith.constant 0 : index
    %c0_75 = arith.constant 0 : index
    %98 = vector.load %arg10[%c1_73, %c0_74, %c0_75] : memref<8x16x32xbf16, #tpu.memory_space<vmem>>, vector<1x16x32xbf16>
    %99 = vector.shape_cast %98 : vector<1x16x32xbf16> to vector<16x32xbf16>
    %100 = arith.extf %99 : vector<16x32xbf16> to vector<16x32xf32>
    %cst_76 = arith.constant 0.933333337 : f32
    %101 = vector.broadcast %cst_76 : f32 to vector<16x32xf32>
    %102 = arith.mulf %100, %101 : vector<16x32xf32>
    %103 = arith.addf %97, %102 : vector<16x32xf32>
    %104 = arith.truncf %103 : vector<16x32xf32> to vector<16x32xbf16>
    %c0_77 = arith.constant 0 : index
    %c2 = arith.constant 2 : index
    %c0_78 = arith.constant 0 : index
    %c0_79 = arith.constant 0 : index
    %105 = vector.load %arg8[%c0_77, %c2, %c0_78, %c0_79] : memref<1x16x16x32xbf16, #tpu.memory_space<vmem>>, vector<1x1x16x32xbf16>
    %106 = vector.shape_cast %105 : vector<1x1x16x32xbf16> to vector<16x32xbf16>
    %107 = vector.shape_cast %104 : vector<16x32xbf16> to vector<1x1x16x32xbf16>
    tpu.vector_store %arg8[%c0_77, %c2, %c0_78, %c0_79], %107 {strides = array<i32>} : memref<1x16x16x32xbf16, #tpu.memory_space<vmem>>, vector<1x1x16x32xbf16>,
    %c1_80 = arith.constant 1 : index
    %c0_81 = arith.constant 0 : index
    %c0_82 = arith.constant 0 : index
    %108 = vector.load %arg10[%c1_80, %c0_81, %c0_82] : memref<8x16x32xbf16, #tpu.memory_space<vmem>>, vector<1x16x32xbf16>
    %109 = vector.shape_cast %108 : vector<1x16x32xbf16> to vector<16x32xbf16>
    %110 = arith.extf %109 : vector<16x32xbf16> to vector<16x32xf32>
    %cst_83 = arith.constant 6.000000e-01 : f32
    %111 = vector.broadcast %cst_83 : f32 to vector<16x32xf32>
    %112 = arith.mulf %110, %111 : vector<16x32xf32>
    %c2_84 = arith.constant 2 : index
    %c0_85 = arith.constant 0 : index
    %c0_86 = arith.constant 0 : index
    %113 = vector.load %arg10[%c2_84, %c0_85, %c0_86] : memref<8x16x32xbf16, #tpu.memory_space<vmem>>, vector<1x16x32xbf16>
    %114 = vector.shape_cast %113 : vector<1x16x32xbf16> to vector<16x32xbf16>
    %115 = arith.extf %114 : vector<16x32xbf16> to vector<16x32xf32>
    %cst_87 = arith.constant 4.000000e-01 : f32
    %116 = vector.broadcast %cst_87 : f32 to vector<16x32xf32>
    %117 = arith.mulf %115, %116 : vector<16x32xf32>
    %118 = arith.addf %112, %117 : vector<16x32xf32>
    %119 = arith.truncf %118 : vector<16x32xf32> to vector<16x32xbf16>
    %c0_88 = arith.constant 0 : index
    %c3 = arith.constant 3 : index
    %c0_89 = arith.constant 0 : index
    %c0_90 = arith.constant 0 : index
    %120 = vector.load %arg8[%c0_88, %c3, %c0_89, %c0_90] : memref<1x16x16x32xbf16, #tpu.memory_space<vmem>>, vector<1x1x16x32xbf16>
    %121 = vector.shape_cast %120 : vector<1x1x16x32xbf16> to vector<16x32xbf16>
    %122 = vector.shape_cast %119 : vector<16x32xbf16> to vector<1x1x16x32xbf16>
    tpu.vector_store %arg8[%c0_88, %c3, %c0_89, %c0_90], %122 {strides = array<i32>} : memref<1x16x16x32xbf16, #tpu.memory_space<vmem>>, vector<1x1x16x32xbf16>,
    %c1_91 = arith.constant 1 : index
    %c0_92 = arith.constant 0 : index
    %c0_93 = arith.constant 0 : index
    %123 = vector.load %arg10[%c1_91, %c0_92, %c0_93] : memref<8x16x32xbf16, #tpu.memory_space<vmem>>, vector<1x16x32xbf16>
    %124 = vector.shape_cast %123 : vector<1x16x32xbf16> to vector<16x32xbf16>
    %125 = arith.extf %124 : vector<16x32xbf16> to vector<16x32xf32>
    %cst_94 = arith.constant 0.13333334 : f32
    %126 = vector.broadcast %cst_94 : f32 to vector<16x32xf32>
    %127 = arith.mulf %125, %126 : vector<16x32xf32>
    %c2_95 = arith.constant 2 : index
    %c0_96 = arith.constant 0 : index
    %c0_97 = arith.constant 0 : index
    %128 = vector.load %arg10[%c2_95, %c0_96, %c0_97] : memref<8x16x32xbf16, #tpu.memory_space<vmem>>, vector<1x16x32xbf16>
    %129 = vector.shape_cast %128 : vector<1x16x32xbf16> to vector<16x32xbf16>
    %130 = arith.extf %129 : vector<16x32xbf16> to vector<16x32xf32>
    %cst_98 = arith.constant 0.866666674 : f32
    %131 = vector.broadcast %cst_98 : f32 to vector<16x32xf32>
    %132 = arith.mulf %130, %131 : vector<16x32xf32>
    %133 = arith.addf %127, %132 : vector<16x32xf32>
    %134 = arith.truncf %133 : vector<16x32xf32> to vector<16x32xbf16>
    %c0_99 = arith.constant 0 : index
    %c4 = arith.constant 4 : index
    %c0_100 = arith.constant 0 : index
    %c0_101 = arith.constant 0 : index
    %135 = vector.load %arg8[%c0_99, %c4, %c0_100, %c0_101] : memref<1x16x16x32xbf16, #tpu.memory_space<vmem>>, vector<1x1x16x32xbf16>
    %136 = vector.shape_cast %135 : vector<1x1x16x32xbf16> to vector<16x32xbf16>
    %137 = vector.shape_cast %134 : vector<16x32xbf16> to vector<1x1x16x32xbf16>
    tpu.vector_store %arg8[%c0_99, %c4, %c0_100, %c0_101], %137 {strides = array<i32>} : memref<1x16x16x32xbf16, #tpu.memory_space<vmem>>, vector<1x1x16x32xbf16>,
    %c2_102 = arith.constant 2 : index
    %c0_103 = arith.constant 0 : index
    %c0_104 = arith.constant 0 : index
    %138 = vector.load %arg10[%c2_102, %c0_103, %c0_104] : memref<8x16x32xbf16, #tpu.memory_space<vmem>>, vector<1x16x32xbf16>
    %139 = vector.shape_cast %138 : vector<1x16x32xbf16> to vector<16x32xbf16>
    %140 = arith.extf %139 : vector<16x32xbf16> to vector<16x32xf32>
    %cst_105 = arith.constant 0.666666686 : f32
    %141 = vector.broadcast %cst_105 : f32 to vector<16x32xf32>
    %142 = arith.mulf %140, %141 : vector<16x32xf32>
    %c3_106 = arith.constant 3 : index
    %c0_107 = arith.constant 0 : index
    %c0_108 = arith.constant 0 : index
    %143 = vector.load %arg10[%c3_106, %c0_107, %c0_108] : memref<8x16x32xbf16, #tpu.memory_space<vmem>>, vector<1x16x32xbf16>
    %144 = vector.shape_cast %143 : vector<1x16x32xbf16> to vector<16x32xbf16>
    %145 = arith.extf %144 : vector<16x32xbf16> to vector<16x32xf32>
    %cst_109 = arith.constant 0.333333343 : f32
    %146 = vector.broadcast %cst_109 : f32 to vector<16x32xf32>
    %147 = arith.mulf %145, %146 : vector<16x32xf32>
    %148 = arith.addf %142, %147 : vector<16x32xf32>
    %149 = arith.truncf %148 : vector<16x32xf32> to vector<16x32xbf16>
    %c0_110 = arith.constant 0 : index
    %c5 = arith.constant 5 : index
    %c0_111 = arith.constant 0 : index
    %c0_112 = arith.constant 0 : index
    %150 = vector.load %arg8[%c0_110, %c5, %c0_111, %c0_112] : memref<1x16x16x32xbf16, #tpu.memory_space<vmem>>, vector<1x1x16x32xbf16>
    %151 = vector.shape_cast %150 : vector<1x1x16x32xbf16> to vector<16x32xbf16>
    %152 = vector.shape_cast %149 : vector<16x32xbf16> to vector<1x1x16x32xbf16>
    tpu.vector_store %arg8[%c0_110, %c5, %c0_111, %c0_112], %152 {strides = array<i32>} : memref<1x16x16x32xbf16, #tpu.memory_space<vmem>>, vector<1x1x16x32xbf16>,
    %c2_113 = arith.constant 2 : index
    %c0_114 = arith.constant 0 : index
    %c0_115 = arith.constant 0 : index
    %153 = vector.load %arg10[%c2_113, %c0_114, %c0_115] : memref<8x16x32xbf16, #tpu.memory_space<vmem>>, vector<1x16x32xbf16>
    %154 = vector.shape_cast %153 : vector<1x16x32xbf16> to vector<16x32xbf16>
    %155 = arith.extf %154 : vector<16x32xbf16> to vector<16x32xf32>
    %cst_116 = arith.constant 2.000000e-01 : f32
    %156 = vector.broadcast %cst_116 : f32 to vector<16x32xf32>
    %157 = arith.mulf %155, %156 : vector<16x32xf32>
    %c3_117 = arith.constant 3 : index
    %c0_118 = arith.constant 0 : index
    %c0_119 = arith.constant 0 : index
    %158 = vector.load %arg10[%c3_117, %c0_118, %c0_119] : memref<8x16x32xbf16, #tpu.memory_space<vmem>>, vector<1x16x32xbf16>
    %159 = vector.shape_cast %158 : vector<1x16x32xbf16> to vector<16x32xbf16>
    %160 = arith.extf %159 : vector<16x32xbf16> to vector<16x32xf32>
    %cst_120 = arith.constant 8.000000e-01 : f32
    %161 = vector.broadcast %cst_120 : f32 to vector<16x32xf32>
    %162 = arith.mulf %160, %161 : vector<16x32xf32>
    %163 = arith.addf %157, %162 : vector<16x32xf32>
    %164 = arith.truncf %163 : vector<16x32xf32> to vector<16x32xbf16>
    %c0_121 = arith.constant 0 : index
    %c6 = arith.constant 6 : index
    %c0_122 = arith.constant 0 : index
    %c0_123 = arith.constant 0 : index
    %165 = vector.load %arg8[%c0_121, %c6, %c0_122, %c0_123] : memref<1x16x16x32xbf16, #tpu.memory_space<vmem>>, vector<1x1x16x32xbf16>
    %166 = vector.shape_cast %165 : vector<1x1x16x32xbf16> to vector<16x32xbf16>
    %167 = vector.shape_cast %164 : vector<16x32xbf16> to vector<1x1x16x32xbf16>
    tpu.vector_store %arg8[%c0_121, %c6, %c0_122, %c0_123], %167 {strides = array<i32>} : memref<1x16x16x32xbf16, #tpu.memory_space<vmem>>, vector<1x1x16x32xbf16>,
    %c3_124 = arith.constant 3 : index
    %c0_125 = arith.constant 0 : index
    %c0_126 = arith.constant 0 : index
    %168 = vector.load %arg10[%c3_124, %c0_125, %c0_126] : memref<8x16x32xbf16, #tpu.memory_space<vmem>>, vector<1x16x32xbf16>
    %169 = vector.shape_cast %168 : vector<1x16x32xbf16> to vector<16x32xbf16>
    %170 = arith.extf %169 : vector<16x32xbf16> to vector<16x32xf32>
    %cst_127 = arith.constant 0.733333349 : f32
    %171 = vector.broadcast %cst_127 : f32 to vector<16x32xf32>
    %172 = arith.mulf %170, %171 : vector<16x32xf32>
    %c4_128 = arith.constant 4 : index
    %c0_129 = arith.constant 0 : index
    %c0_130 = arith.constant 0 : index
    %173 = vector.load %arg10[%c4_128, %c0_129, %c0_130] : memref<8x16x32xbf16, #tpu.memory_space<vmem>>, vector<1x16x32xbf16>
    %174 = vector.shape_cast %173 : vector<1x16x32xbf16> to vector<16x32xbf16>
    %175 = arith.extf %174 : vector<16x32xbf16> to vector<16x32xf32>
    %cst_131 = arith.constant 0.266666681 : f32
    %176 = vector.broadcast %cst_131 : f32 to vector<16x32xf32>
    %177 = arith.mulf %175, %176 : vector<16x32xf32>
    %178 = arith.addf %172, %177 : vector<16x32xf32>
    %179 = arith.truncf %178 : vector<16x32xf32> to vector<16x32xbf16>
    %c0_132 = arith.constant 0 : index
    %c7 = arith.constant 7 : index
    %c0_133 = arith.constant 0 : index
    %c0_134 = arith.constant 0 : index
    %180 = vector.load %arg8[%c0_132, %c7, %c0_133, %c0_134] : memref<1x16x16x32xbf16, #tpu.memory_space<vmem>>, vector<1x1x16x32xbf16>
    %181 = vector.shape_cast %180 : vector<1x1x16x32xbf16> to vector<16x32xbf16>
    %182 = vector.shape_cast %179 : vector<16x32xbf16> to vector<1x1x16x32xbf16>
    tpu.vector_store %arg8[%c0_132, %c7, %c0_133, %c0_134], %182 {strides = array<i32>} : memref<1x16x16x32xbf16, #tpu.memory_space<vmem>>, vector<1x1x16x32xbf16>,
    %c3_135 = arith.constant 3 : index
    %c0_136 = arith.constant 0 : index
    %c0_137 = arith.constant 0 : index
    %183 = vector.load %arg10[%c3_135, %c0_136, %c0_137] : memref<8x16x32xbf16, #tpu.memory_space<vmem>>, vector<1x16x32xbf16>
    %184 = vector.shape_cast %183 : vector<1x16x32xbf16> to vector<16x32xbf16>
    %185 = arith.extf %184 : vector<16x32xbf16> to vector<16x32xf32>
    %cst_138 = arith.constant 0.266666681 : f32
    %186 = vector.broadcast %cst_138 : f32 to vector<16x32xf32>
    %187 = arith.mulf %185, %186 : vector<16x32xf32>
    %c4_139 = arith.constant 4 : index
    %c0_140 = arith.constant 0 : index
    %c0_141 = arith.constant 0 : index
    %188 = vector.load %arg10[%c4_139, %c0_140, %c0_141] : memref<8x16x32xbf16, #tpu.memory_space<vmem>>, vector<1x16x32xbf16>
    %189 = vector.shape_cast %188 : vector<1x16x32xbf16> to vector<16x32xbf16>
    %190 = arith.extf %189 : vector<16x32xbf16> to vector<16x32xf32>
    %cst_142 = arith.constant 0.733333349 : f32
    %191 = vector.broadcast %cst_142 : f32 to vector<16x32xf32>
    %192 = arith.mulf %190, %191 : vector<16x32xf32>
    %193 = arith.addf %187, %192 : vector<16x32xf32>
    %194 = arith.truncf %193 : vector<16x32xf32> to vector<16x32xbf16>
    %c0_143 = arith.constant 0 : index
    %c8 = arith.constant 8 : index
    %c0_144 = arith.constant 0 : index
    %c0_145 = arith.constant 0 : index
    %195 = vector.load %arg8[%c0_143, %c8, %c0_144, %c0_145] : memref<1x16x16x32xbf16, #tpu.memory_space<vmem>>, vector<1x1x16x32xbf16>
    %196 = vector.shape_cast %195 : vector<1x1x16x32xbf16> to vector<16x32xbf16>
    %197 = vector.shape_cast %194 : vector<16x32xbf16> to vector<1x1x16x32xbf16>
    tpu.vector_store %arg8[%c0_143, %c8, %c0_144, %c0_145], %197 {strides = array<i32>} : memref<1x16x16x32xbf16, #tpu.memory_space<vmem>>, vector<1x1x16x32xbf16>,
    %c4_146 = arith.constant 4 : index
    %c0_147 = arith.constant 0 : index
    %c0_148 = arith.constant 0 : index
    %198 = vector.load %arg10[%c4_146, %c0_147, %c0_148] : memref<8x16x32xbf16, #tpu.memory_space<vmem>>, vector<1x16x32xbf16>
    %199 = vector.shape_cast %198 : vector<1x16x32xbf16> to vector<16x32xbf16>
    %200 = arith.extf %199 : vector<16x32xbf16> to vector<16x32xf32>
    %cst_149 = arith.constant 8.000000e-01 : f32
    %201 = vector.broadcast %cst_149 : f32 to vector<16x32xf32>
    %202 = arith.mulf %200, %201 : vector<16x32xf32>
    %c5_150 = arith.constant 5 : index
    %c0_151 = arith.constant 0 : index
    %c0_152 = arith.constant 0 : index
    %203 = vector.load %arg10[%c5_150, %c0_151, %c0_152] : memref<8x16x32xbf16, #tpu.memory_space<vmem>>, vector<1x16x32xbf16>
    %204 = vector.shape_cast %203 : vector<1x16x32xbf16> to vector<16x32xbf16>
    %205 = arith.extf %204 : vector<16x32xbf16> to vector<16x32xf32>
    %cst_153 = arith.constant 2.000000e-01 : f32
    %206 = vector.broadcast %cst_153 : f32 to vector<16x32xf32>
    %207 = arith.mulf %205, %206 : vector<16x32xf32>
    %208 = arith.addf %202, %207 : vector<16x32xf32>
    %209 = arith.truncf %208 : vector<16x32xf32> to vector<16x32xbf16>
    %c0_154 = arith.constant 0 : index
    %c9_155 = arith.constant 9 : index
    %c0_156 = arith.constant 0 : index
    %c0_157 = arith.constant 0 : index
    %210 = vector.load %arg8[%c0_154, %c9_155, %c0_156, %c0_157] : memref<1x16x16x32xbf16, #tpu.memory_space<vmem>>, vector<1x1x16x32xbf16>
    %211 = vector.shape_cast %210 : vector<1x1x16x32xbf16> to vector<16x32xbf16>
    %212 = vector.shape_cast %209 : vector<16x32xbf16> to vector<1x1x16x32xbf16>
    tpu.vector_store %arg8[%c0_154, %c9_155, %c0_156, %c0_157], %212 {strides = array<i32>} : memref<1x16x16x32xbf16, #tpu.memory_space<vmem>>, vector<1x1x16x32xbf16>,
    %c4_158 = arith.constant 4 : index
    %c0_159 = arith.constant 0 : index
    %c0_160 = arith.constant 0 : index
    %213 = vector.load %arg10[%c4_158, %c0_159, %c0_160] : memref<8x16x32xbf16, #tpu.memory_space<vmem>>, vector<1x16x32xbf16>
    %214 = vector.shape_cast %213 : vector<1x16x32xbf16> to vector<16x32xbf16>
    %215 = arith.extf %214 : vector<16x32xbf16> to vector<16x32xf32>
    %cst_161 = arith.constant 0.333333343 : f32
    %216 = vector.broadcast %cst_161 : f32 to vector<16x32xf32>
    %217 = arith.mulf %215, %216 : vector<16x32xf32>
    %c5_162 = arith.constant 5 : index
    %c0_163 = arith.constant 0 : index
    %c0_164 = arith.constant 0 : index
    %218 = vector.load %arg10[%c5_162, %c0_163, %c0_164] : memref<8x16x32xbf16, #tpu.memory_space<vmem>>, vector<1x16x32xbf16>
    %219 = vector.shape_cast %218 : vector<1x16x32xbf16> to vector<16x32xbf16>
    %220 = arith.extf %219 : vector<16x32xbf16> to vector<16x32xf32>
    %cst_165 = arith.constant 0.666666686 : f32
    %221 = vector.broadcast %cst_165 : f32 to vector<16x32xf32>
    %222 = arith.mulf %220, %221 : vector<16x32xf32>
    %223 = arith.addf %217, %222 : vector<16x32xf32>
    %224 = arith.truncf %223 : vector<16x32xf32> to vector<16x32xbf16>
    %c0_166 = arith.constant 0 : index
    %c10 = arith.constant 10 : index
    %c0_167 = arith.constant 0 : index
    %c0_168 = arith.constant 0 : index
    %225 = vector.load %arg8[%c0_166, %c10, %c0_167, %c0_168] : memref<1x16x16x32xbf16, #tpu.memory_space<vmem>>, vector<1x1x16x32xbf16>
    %226 = vector.shape_cast %225 : vector<1x1x16x32xbf16> to vector<16x32xbf16>
    %227 = vector.shape_cast %224 : vector<16x32xbf16> to vector<1x1x16x32xbf16>
    tpu.vector_store %arg8[%c0_166, %c10, %c0_167, %c0_168], %227 {strides = array<i32>} : memref<1x16x16x32xbf16, #tpu.memory_space<vmem>>, vector<1x1x16x32xbf16>,
    %c5_169 = arith.constant 5 : index
    %c0_170 = arith.constant 0 : index
    %c0_171 = arith.constant 0 : index
    %228 = vector.load %arg10[%c5_169, %c0_170, %c0_171] : memref<8x16x32xbf16, #tpu.memory_space<vmem>>, vector<1x16x32xbf16>
    %229 = vector.shape_cast %228 : vector<1x16x32xbf16> to vector<16x32xbf16>
    %230 = arith.extf %229 : vector<16x32xbf16> to vector<16x32xf32>
    %cst_172 = arith.constant 0.866666674 : f32
    %231 = vector.broadcast %cst_172 : f32 to vector<16x32xf32>
    %232 = arith.mulf %230, %231 : vector<16x32xf32>
    %c6_173 = arith.constant 6 : index
    %c0_174 = arith.constant 0 : index
    %c0_175 = arith.constant 0 : index
    %233 = vector.load %arg10[%c6_173, %c0_174, %c0_175] : memref<8x16x32xbf16, #tpu.memory_space<vmem>>, vector<1x16x32xbf16>
    %234 = vector.shape_cast %233 : vector<1x16x32xbf16> to vector<16x32xbf16>
    %235 = arith.extf %234 : vector<16x32xbf16> to vector<16x32xf32>
    %cst_176 = arith.constant 0.13333334 : f32
    %236 = vector.broadcast %cst_176 : f32 to vector<16x32xf32>
    %237 = arith.mulf %235, %236 : vector<16x32xf32>
    %238 = arith.addf %232, %237 : vector<16x32xf32>
    %239 = arith.truncf %238 : vector<16x32xf32> to vector<16x32xbf16>
    %c0_177 = arith.constant 0 : index
    %c11 = arith.constant 11 : index
    %c0_178 = arith.constant 0 : index
    %c0_179 = arith.constant 0 : index
    %240 = vector.load %arg8[%c0_177, %c11, %c0_178, %c0_179] : memref<1x16x16x32xbf16, #tpu.memory_space<vmem>>, vector<1x1x16x32xbf16>
    %241 = vector.shape_cast %240 : vector<1x1x16x32xbf16> to vector<16x32xbf16>
    %242 = vector.shape_cast %239 : vector<16x32xbf16> to vector<1x1x16x32xbf16>
    tpu.vector_store %arg8[%c0_177, %c11, %c0_178, %c0_179], %242 {strides = array<i32>} : memref<1x16x16x32xbf16, #tpu.memory_space<vmem>>, vector<1x1x16x32xbf16>,
    %c5_180 = arith.constant 5 : index
    %c0_181 = arith.constant 0 : index
    %c0_182 = arith.constant 0 : index
    %243 = vector.load %arg10[%c5_180, %c0_181, %c0_182] : memref<8x16x32xbf16, #tpu.memory_space<vmem>>, vector<1x16x32xbf16>
    %244 = vector.shape_cast %243 : vector<1x16x32xbf16> to vector<16x32xbf16>
    %245 = arith.extf %244 : vector<16x32xbf16> to vector<16x32xf32>
    %cst_183 = arith.constant 4.000000e-01 : f32
    %246 = vector.broadcast %cst_183 : f32 to vector<16x32xf32>
    %247 = arith.mulf %245, %246 : vector<16x32xf32>
    %c6_184 = arith.constant 6 : index
    %c0_185 = arith.constant 0 : index
    %c0_186 = arith.constant 0 : index
    %248 = vector.load %arg10[%c6_184, %c0_185, %c0_186] : memref<8x16x32xbf16, #tpu.memory_space<vmem>>, vector<1x16x32xbf16>
    %249 = vector.shape_cast %248 : vector<1x16x32xbf16> to vector<16x32xbf16>
    %250 = arith.extf %249 : vector<16x32xbf16> to vector<16x32xf32>
    %cst_187 = arith.constant 6.000000e-01 : f32
    %251 = vector.broadcast %cst_187 : f32 to vector<16x32xf32>
    %252 = arith.mulf %250, %251 : vector<16x32xf32>
    %253 = arith.addf %247, %252 : vector<16x32xf32>
    %254 = arith.truncf %253 : vector<16x32xf32> to vector<16x32xbf16>
    %c0_188 = arith.constant 0 : index
    %c12 = arith.constant 12 : index
    %c0_189 = arith.constant 0 : index
    %c0_190 = arith.constant 0 : index
    %255 = vector.load %arg8[%c0_188, %c12, %c0_189, %c0_190] : memref<1x16x16x32xbf16, #tpu.memory_space<vmem>>, vector<1x1x16x32xbf16>
    %256 = vector.shape_cast %255 : vector<1x1x16x32xbf16> to vector<16x32xbf16>
    %257 = vector.shape_cast %254 : vector<16x32xbf16> to vector<1x1x16x32xbf16>
    tpu.vector_store %arg8[%c0_188, %c12, %c0_189, %c0_190], %257 {strides = array<i32>} : memref<1x16x16x32xbf16, #tpu.memory_space<vmem>>, vector<1x1x16x32xbf16>,
    %c6_191 = arith.constant 6 : index
    %c0_192 = arith.constant 0 : index
    %c0_193 = arith.constant 0 : index
    %258 = vector.load %arg10[%c6_191, %c0_192, %c0_193] : memref<8x16x32xbf16, #tpu.memory_space<vmem>>, vector<1x16x32xbf16>
    %259 = vector.shape_cast %258 : vector<1x16x32xbf16> to vector<16x32xbf16>
    %260 = arith.extf %259 : vector<16x32xbf16> to vector<16x32xf32>
    %cst_194 = arith.constant 0.933333337 : f32
    %261 = vector.broadcast %cst_194 : f32 to vector<16x32xf32>
    %262 = arith.mulf %260, %261 : vector<16x32xf32>
    %c7_195 = arith.constant 7 : index
    %c0_196 = arith.constant 0 : index
    %c0_197 = arith.constant 0 : index
    %263 = vector.load %arg10[%c7_195, %c0_196, %c0_197] : memref<8x16x32xbf16, #tpu.memory_space<vmem>>, vector<1x16x32xbf16>
    %264 = vector.shape_cast %263 : vector<1x16x32xbf16> to vector<16x32xbf16>
    %265 = arith.extf %264 : vector<16x32xbf16> to vector<16x32xf32>
    %cst_198 = arith.constant 0.0666666701 : f32
    %266 = vector.broadcast %cst_198 : f32 to vector<16x32xf32>
    %267 = arith.mulf %265, %266 : vector<16x32xf32>
    %268 = arith.addf %262, %267 : vector<16x32xf32>
    %269 = arith.truncf %268 : vector<16x32xf32> to vector<16x32xbf16>
    %c0_199 = arith.constant 0 : index
    %c13 = arith.constant 13 : index
    %c0_200 = arith.constant 0 : index
    %c0_201 = arith.constant 0 : index
    %270 = vector.load %arg8[%c0_199, %c13, %c0_200, %c0_201] : memref<1x16x16x32xbf16, #tpu.memory_space<vmem>>, vector<1x1x16x32xbf16>
    %271 = vector.shape_cast %270 : vector<1x1x16x32xbf16> to vector<16x32xbf16>
    %272 = vector.shape_cast %269 : vector<16x32xbf16> to vector<1x1x16x32xbf16>
    tpu.vector_store %arg8[%c0_199, %c13, %c0_200, %c0_201], %272 {strides = array<i32>} : memref<1x16x16x32xbf16, #tpu.memory_space<vmem>>, vector<1x1x16x32xbf16>,
    %c6_202 = arith.constant 6 : index
    %c0_203 = arith.constant 0 : index
    %c0_204 = arith.constant 0 : index
    %273 = vector.load %arg10[%c6_202, %c0_203, %c0_204] : memref<8x16x32xbf16, #tpu.memory_space<vmem>>, vector<1x16x32xbf16>
    %274 = vector.shape_cast %273 : vector<1x16x32xbf16> to vector<16x32xbf16>
    %275 = arith.extf %274 : vector<16x32xbf16> to vector<16x32xf32>
    %cst_205 = arith.constant 0.466666669 : f32
    %276 = vector.broadcast %cst_205 : f32 to vector<16x32xf32>
    %277 = arith.mulf %275, %276 : vector<16x32xf32>
    %c7_206 = arith.constant 7 : index
    %c0_207 = arith.constant 0 : index
    %c0_208 = arith.constant 0 : index
    %278 = vector.load %arg10[%c7_206, %c0_207, %c0_208] : memref<8x16x32xbf16, #tpu.memory_space<vmem>>, vector<1x16x32xbf16>
    %279 = vector.shape_cast %278 : vector<1x16x32xbf16> to vector<16x32xbf16>
    %280 = arith.extf %279 : vector<16x32xbf16> to vector<16x32xf32>
    %cst_209 = arith.constant 0.533333361 : f32
    %281 = vector.broadcast %cst_209 : f32 to vector<16x32xf32>
    %282 = arith.mulf %280, %281 : vector<16x32xf32>
    %283 = arith.addf %277, %282 : vector<16x32xf32>
    %284 = arith.truncf %283 : vector<16x32xf32> to vector<16x32xbf16>
    %c0_210 = arith.constant 0 : index
    %c14 = arith.constant 14 : index
    %c0_211 = arith.constant 0 : index
    %c0_212 = arith.constant 0 : index
    %285 = vector.load %arg8[%c0_210, %c14, %c0_211, %c0_212] : memref<1x16x16x32xbf16, #tpu.memory_space<vmem>>, vector<1x1x16x32xbf16>
    %286 = vector.shape_cast %285 : vector<1x1x16x32xbf16> to vector<16x32xbf16>
    %287 = vector.shape_cast %284 : vector<16x32xbf16> to vector<1x1x16x32xbf16>
    tpu.vector_store %arg8[%c0_210, %c14, %c0_211, %c0_212], %287 {strides = array<i32>} : memref<1x16x16x32xbf16, #tpu.memory_space<vmem>>, vector<1x1x16x32xbf16>,
    %c6_213 = arith.constant 6 : index
    %c0_214 = arith.constant 0 : index
    %c0_215 = arith.constant 0 : index
    %288 = vector.load %arg10[%c6_213, %c0_214, %c0_215] : memref<8x16x32xbf16, #tpu.memory_space<vmem>>, vector<1x16x32xbf16>
    %289 = vector.shape_cast %288 : vector<1x16x32xbf16> to vector<16x32xbf16>
    %290 = arith.extf %289 : vector<16x32xbf16> to vector<16x32xf32>
    %cst_216 = arith.constant 0.000000e+00 : f32
    %291 = vector.broadcast %cst_216 : f32 to vector<16x32xf32>
    %292 = arith.mulf %290, %291 : vector<16x32xf32>
    %c7_217 = arith.constant 7 : index
    %c0_218 = arith.constant 0 : index
    %c0_219 = arith.constant 0 : index
    %293 = vector.load %arg10[%c7_217, %c0_218, %c0_219] : memref<8x16x32xbf16, #tpu.memory_space<vmem>>, vector<1x16x32xbf16>
    %294 = vector.shape_cast %293 : vector<1x16x32xbf16> to vector<16x32xbf16>
    %295 = arith.extf %294 : vector<16x32xbf16> to vector<16x32xf32>
    %cst_220 = arith.constant 1.000000e+00 : f32
    %296 = vector.broadcast %cst_220 : f32 to vector<16x32xf32>
    %297 = arith.mulf %295, %296 : vector<16x32xf32>
    %298 = arith.addf %292, %297 : vector<16x32xf32>
    %299 = arith.truncf %298 : vector<16x32xf32> to vector<16x32xbf16>
    %c0_221 = arith.constant 0 : index
    %c15 = arith.constant 15 : index
    %c0_222 = arith.constant 0 : index
    %c0_223 = arith.constant 0 : index
    %300 = vector.load %arg8[%c0_221, %c15, %c0_222, %c0_223] : memref<1x16x16x32xbf16, #tpu.memory_space<vmem>>, vector<1x1x16x32xbf16>
    %301 = vector.shape_cast %300 : vector<1x1x16x32xbf16> to vector<16x32xbf16>
    %302 = vector.shape_cast %299 : vector<16x32xbf16> to vector<1x1x16x32xbf16>
    tpu.vector_store %arg8[%c0_221, %c15, %c0_222, %c0_223], %302 {strides = array<i32>} : memref<1x16x16x32xbf16, #tpu.memory_space<vmem>>, vector<1x1x16x32xbf16>,
    return
  }
  func.func @transform_0(%arg0: i32, %arg1: i32) -> (i32, i32, i32, i32) {
    %c0_i32 = arith.constant 0 : i32
    %c0_i32_0 = arith.constant 0 : i32
    %c0_i32_1 = arith.constant 0 : i32
    %c0_i32_2 = arith.constant 0 : i32
    return %arg0, %c0_i32, %c0_i32_0, %c0_i32_1 : i32, i32, i32, i32
  }
  func.func @transform_1(%arg0: i32, %arg1: i32) -> (i32, i32) {
    %c0_i32 = arith.constant 0 : i32
    %c0_i32_0 = arith.constant 0 : i32
    return %c0_i32, %arg1 : i32, i32
  }
  func.func @transform_2(%arg0: i32, %arg1: i32) -> (i32, i32) {
    %c0_i32 = arith.constant 0 : i32
    %c0_i32_0 = arith.constant 0 : i32
    return %c0_i32, %arg1 : i32, i32
  }
  func.func @transform_3(%arg0: i32, %arg1: i32) -> (i32, i32) {
    %c0_i32 = arith.constant 0 : i32
    %c0_i32_0 = arith.constant 0 : i32
    return %c0_i32, %arg1 : i32, i32
  }
  func.func @transform_4(%arg0: i32, %arg1: i32) -> (i32, i32) {
    %c0_i32 = arith.constant 0 : i32
    return %arg1, %arg1 : i32, i32
  }
  func.func @transform_5(%arg0: i32, %arg1: i32) -> (i32, i32) {
    %c0_i32 = arith.constant 0 : i32
    %c0_i32_0 = arith.constant 0 : i32
    %c0_i32_1 = arith.constant 0 : i32
    return %c0_i32, %c0_i32_0 : i32, i32
  }
  func.func @transform_6(%arg0: i32, %arg1: i32) -> (i32, i32, i32, i32) {
    %c0_i32 = arith.constant 0 : i32
    %c0_i32_0 = arith.constant 0 : i32
    %c0_i32_1 = arith.constant 0 : i32
    return %arg0, %c0_i32, %c0_i32_0, %arg1 : i32, i32, i32, i32
  }
}

</mosaic_0001>

<bundles_post_ra>
// kernel: tpu_custom_call.1
= control target key start
LH: loop header
LB: loop body
LE: loop exit
PB: predicated region body
PF: predicated region fallthrough
CT: control target
= control target key end

     0   :  { %11 = vsyncpa [#allocation5], 0  ;;  %s3523_s0 = inlined_call_operand.vmem [shape: bf16[2,8,8,16], index: 0, kind: input, shape index: {}]   ;;  %s3524_s1 = inlined_call_operand.vmem [shape: bf16[144,32], index: 1, kind: input, shape index: {}]   ;;  %s3525_s2 = inlined_call_operand.vmem [shape: f32[1,32], index: 2, kind: input, shape index: {}]   ;;  %s3526_s3 = inlined_call_operand.vmem [shape: f32[1,32], index: 3, kind: input, shape index: {}]   ;;  %s3527_s4 = inlined_call_operand.vmem [shape: f32[32,32], index: 4, kind: input, shape index: {}]   ;;  %s3528_s5 = inlined_call_operand.vmem [shape: bf16[16,8], index: 5, kind: input, shape index: {}]   ;;  %s3529_s6 = inlined_call_operand.hbm [shape: bf16[2,16,16,32], index: 6, kind: output, shape index: {}]  }
   0x1   :  { %13 = vsyncpa [#allocation5 + $0x1], 0  ;;  %s2933_s21 = smov 0   ;;  %s2935_s22 = smov 0  }
   0x2   :  { %s2937_s23 = smov 0   ;;  %s2939_s24 = smov 0  }
   0x3   :  { %s2941_s25 = smov 0   ;;  %s2943_s26 = smov 0  }
   0x4 LB: > { %s2300_s27 = sadd.s32 4294967295, %s2887_s26   ;;  %s2301_s28 = sadd.s32 4294967294, %s2887_s26   ;;  %s2887_s26 = sphi %s2943_s26, %s19_s26   ;;  %s2883_s25 = sphi %s2941_s25, %s3542_s25   ;;  %s2879_s24 = sphi %s2939_s24, %s3541_s24   ;;  %s2875_s23 = sphi %s2937_s23, %s3540_s23   ;;  %s2871_s22 = sphi %s2935_s22, %s3539_s22   ;;  %s2867_s21 = sphi %s2933_s21, %s3538_s21  }
   0x5   : > { %s31_s29 = sadd.s32 1, %s2883_s25  ;;  %s193_s30 = sadd.s32 1, %s2875_s23 }
   0x6   : > { %p33_p0 = scmp.ge.s32.totalorder %s31_s29, 2  ;;  %p203_p1 = scmp.ne.s32.totalorder %s2875_s23, %s2871_s22 }
   0x7   : > { %p204_p2 = scmp.eq.s32.totalorder %s2300_s27, 1  ;;  %p209_p3 = scmp.ne.s32.totalorder %s2871_s22, %s2867_s21 }
   0x8   : > { %s3544_s29 = smov (%p33_p0, %s31_s29), 0  ;;  %p210_p5 = scmp.eq.s32.totalorder %s2301_s28, 1 }
   0x9   : > { %p2973_p4 = por %p204_p2, %p203_p1  ;;  %s188_s8 = ssub.s32 %s2883_s25, %s3544_s29 }
   0xa   : > { %p2308_p6 = scmp.ge.s32.totalorder %s2887_s26, 1  ;;  %p191_p7 = scmp.eq.s32.totalorder %s188_s8, 0 }
   0xb   : > { %p2980_p8 = por %p210_p5, %p209_p3  ;;  %p270_p9 = scmp.lt.s32.totalorder %s2887_s26, 3 }
   0xc   : > { %s2986_s10 = scalar_select %p191_p7, %s2875_s23, %s193_s30  }
   0xd   : > { %p271_p10 = pnand %p2308_p6, %p270_p9 }
   0xe   : > { %p318_p11 = scmp.lt.s32.totalorder (!%p271_p10), %s2879_s24, 1  ;;  %vm349_vm0 = vcmask (!%p271_p10), 122880   ;;  %vm350_vm1 = vsmask.f32 (!%p271_p10), 256  ;;  %v352_v0 = vld [vmem:[#allocation2 + $0x8] sm:$0x1] (!%p271_p10) }
   0xf   : > { %274 = sbr.rel (%p271_p10) target bundleno = 1275 (0x4fb), region = 44  ;;  %vm2989_vm2 = vmand (!%p271_p10), %vm349_vm0, %vm350_vm1  ;;  %vm376_vm3 = vcmask (!%p271_p10), 130052   ;;  %vm377_vm4 = vsmask.f32 (!%p271_p10), 7954  ;;  %v379_v2 = vld [vmem:[#allocation2 + $0x8] sm:$0xf0] (!%p271_p10) }
  0x10   : > { %v353_v3 = vsel (!%p271_p10), %vm2989_vm2, 0, %v352_v0  ;;  %vm2996_vm5 = vmand (!%p271_p10), %vm376_vm3, %vm377_vm4  ;;  %vm499_vm6 = vcmask (!%p271_p10), 126976   ;;  %v355_v5 = vld [vmem:[#allocation2 + $0x10] sm:$0x1] (!%p271_p10)  ;;  %vm500_vm7 = vsmask.f32 (!%p271_p10), 4354 }
  0x11   : > { %354 = vst [vmem:[#allocation2 + $0x8] sm:$0x1] (!%p271_p10), %v353_v3  ;;  %v380_v6 = vsel (!%p271_p10), %vm2996_vm5, 0, %v379_v2  ;;  %v356_v7 = vsel (!%p271_p10), %vm2989_vm2, 0, %v355_v5  ;;  %v382_v8 = vld [vmem:[#allocation2 + $0x10] sm:$0xf0] (!%p271_p10)  ;;  %vm3025_vm9 = vmand (!%p271_p10), %vm499_vm6, %vm500_vm7 }
  0x12   : > { %381 = vst [vmem:[#allocation2 + $0x8] sm:$0xf0] (!%p271_p10), %v380_v6  ;;  %357 = vst [vmem:[#allocation2 + $0x10] sm:$0x1] (!%p271_p10), %v356_v7  ;;  %v383_v9 = vsel (!%p271_p10), %vm2996_vm5, 0, %v382_v8  ;;  %vm343_vm8 = vcmask (!%p271_p10), 130048  }
  0x13   : > { %v358_v10 = vld [vmem:[#allocation2 + $0x18] sm:$0x1] (!%p271_p10)  ;;  %v385_v11 = vld [vmem:[#allocation2 + $0x18] sm:$0xf0] (!%p271_p10)  ;;  %384 = vst [vmem:[#allocation2 + $0x10] sm:$0xf0] (!%p271_p10), %v383_v9 }
  0x14   : > { %v359_v12 = vsel (!%p271_p10), %vm2989_vm2, 0, %v358_v10  ;;  %v386_v13 = vsel (!%p271_p10), %vm2996_vm5, 0, %v385_v11  ;;  %v361_v14 = vld [vmem:[#allocation2 + $0x20] sm:$0x1] (!%p271_p10)  ;;  %v388_v15 = vld [vmem:[#allocation2 + $0x20] sm:$0xf0] (!%p271_p10) }
  0x15   : > { %360 = vst [vmem:[#allocation2 + $0x18] sm:$0x1] (!%p271_p10), %v359_v12  ;;  %387 = vst [vmem:[#allocation2 + $0x18] sm:$0xf0] (!%p271_p10), %v386_v13  ;;  %v362_v21 = vsel (!%p271_p10), %vm2989_vm2, 0, %v361_v14  ;;  %v389_v22 = vsel (!%p271_p10), %vm2996_vm5, 0, %v388_v15 }
  0x16   : > { %s319_s11 = scalar_select %p318_p11, %s2879_s24, 1  ;;  %363 = vst [vmem:[#allocation2 + $0x20] sm:$0x1] %v362_v21  ;;  %390 = vst [vmem:[#allocation2 + $0x20] sm:$0xf0] %v389_v22  ;;  %v2889_v49 = vmov 0  }
  0x17   : > { %v364_v29 = vld [vmem:[#allocation2 + $0x28] sm:$0x1]  ;;  %v391_v30 = vld [vmem:[#allocation2 + $0x28] sm:$0xf0]  ;;  %v367_v47 = vld [vmem:[#allocation2 + $0x30] sm:$0x1] }
  0x18   : > { %s2441_s12 = sshll.u32 %s319_s11, 5  ;;  %v365_v39 = vsel %vm2989_vm2, 0, %v364_v29  ;;  %v392_v40 = vsel %vm2996_vm5, 0, %v391_v30  ;;  %v394_v48 = vld [vmem:[#allocation2 + $0x30] sm:$0xf0]  ;;  %346 = vst.msk [vmem:[#allocation2 + $0x48] sm:$0xff] %vm343_vm8, %v2889_v49 }
  0x19   : > { %s3009_s15 = scalar_lea.vmem %s3523_s0, %s2441_s12  ;;  %v502_v32 = vld [vmem:[#allocation2 + $0x8] sm:$0x1f]  ;;  %366 = vst [vmem:[#allocation2 + $0x28] sm:$0x1] %v365_v39  ;;  %393 = vst [vmem:[#allocation2 + $0x28] sm:$0xf0] %v392_v40 }
  0x1a   : > { %v2787_v16 = vld [vmem:[%s3009_s15] ss:$0 sps:$4 sm:$0xff]   ;;  %v2788_v17 = vld [vmem:[%s3009_s15 + $0x4] ss:$0 sps:$4 sm:$0xff]   ;;  %v2789_v18 = vld [vmem:[%s3009_s15 + $0x8] ss:$0 sps:$4 sm:$0xff]  }
  0x1b   : > { %v436_v19 = vshrl.u32 %v2787_v16, 16  ;;  %v439_v20 = vshll.u32 %v2787_v16, 16  ;;  %v443_v23 = vshrl.u32 %v2788_v17, 16  ;;  %v446_v24 = vshll.u32 %v2788_v17, 16  ;;  %v2790_v27 = vld [vmem:[%s3009_s15 + $0xc] ss:$0 sps:$4 sm:$0xff]  }
  0x1c   : > { %v450_v25 = vshrl.u32 %v2789_v18, 16  ;;  %v453_v26 = vshll.u32 %v2789_v18, 16  ;;  %v457_v35 = vshrl.u32 %v2790_v27, 16  ;;  %v460_v36 = vshll.u32 %v2790_v27, 16  ;;  %v505_v38 = vld [vmem:[#allocation2 + $0x10] sm:$0x1f] }
  0x1d   : > { %v438_v28 = vrot.slane %v436_v19, 7  ;;  %v445_v33 = vrot.slane %v443_v23, 7  ;;  %v508_v43 = vld [vmem:[#allocation2 + $0x18] sm:$0x1f]  ;;  %v2791_v45 = vld [vmem:[%s3009_s15 + $0x10] ss:$0 sps:$4 sm:$0xff]  }
  0x1e   : > { %v452_v34 = vrot.slane %v450_v25, 7  ;;  %v459_v44 = vrot.slane %v457_v35, 7  ;;  %344 = vst.msk [vmem:[#allocation2] sm:$0xff] %vm343_vm8, %v2889_v49  ;;  %347 = vst.msk [vmem:[#allocation2 + $0x50] sm:$0xff] %vm343_vm8, %v2889_v49  ;;  %v464_v53 = vshrl.u32 %v2791_v45, 16  ;;  %v2795_v56 = vld [vmem:[%s3524_s1 + $0x18] sm:$0xff]  }
  0x1f   : > { %v441_v37 = vor.u32 %v439_v20, %v438_v28  ;;  %v448_v41 = vor.u32 %v446_v24, %v445_v33  ;;  %v2792_v54 = vld [vmem:[%s3009_s15 + $0x14] ss:$0 sps:$4 sm:$0xff]   ;;  %v370_v55 = vld [vmem:[#allocation2 + $0x38] sm:$0x1]  ;;  %v511_v57 = vld [vmem:[#allocation2 + $0x20] sm:$0x1f]  ;;  %2540 = vmatprep.subr.bf16.mxu0 %v2795_v56  ;;  %2688 = vmatprep.subr.bf16.mxu1 %v2795_v56 }
  0x20   : > { %v455_v42 = vor.u32 %v453_v26, %v452_v34  ;;  %v462_v52 = vor.u32 %v460_v36, %v459_v44  ;;  %v467_v58 = vshll.u32 %v2791_v45, 16  ;;  %v368_v59 = vsel %vm2989_vm2, 0, %v367_v47  ;;  %v397_v3 = vld [vmem:[#allocation2 + $0x38] sm:$0xf0]  ;;  %v2796_v5 = vld [vmem:[%s3524_s1 + $0x20] sm:$0xff]   ;;  %2541 = vmatpush3.bf16.msra.mxu0 %v2795_v56  ;;  %2691 = vmatpush3.bf16.msra.mxu1 %v2795_v56  ;;  %v2797_v12 = vld [vmem:[%s3524_s1 + $0x28] sm:$0xff]  }
  0x21   : > { %v503_v46 = vsel %vm3025_vm9, %v441_v37, %v502_v32  ;;  %v506_v50 = vsel %vm3025_vm9, %v448_v41, %v505_v38  ;;  %v395_v60 = vsel %vm2996_vm5, 0, %v394_v48  ;;  %v371_v61 = vsel %vm2989_vm2, 0, %v370_v55  ;;  %369 = vst [vmem:[#allocation2 + $0x30] sm:$0x1] %v368_v59  ;;  %v2793_v7 = vld [vmem:[%s3009_s15 + $0x18] ss:$0 sps:$4 sm:$0xff]   ;;  %2542 = vmatprep.subr.bf16.mxu0 %v2796_v5  ;;  %2689 = vmatprep.subr.bf16.mxu1 %v2796_v5 }
  0x22   : > { %504 = vst [vmem:[#allocation2 + $0x8] sm:$0x1f] %v503_v46  ;;  %v509_v51 = vsel %vm3025_vm9, %v455_v42, %v508_v43  ;;  %507 = vst [vmem:[#allocation2 + $0x10] sm:$0x1f] %v506_v50  ;;  %v512_v62 = vsel %vm3025_vm9, %v462_v52, %v511_v57  ;;  %v466_v63 = vrot.slane %v464_v53, 7  ;;  %v471_v0 = vshrl.u32 %v2792_v54, 16 }
  0x23   : > { %510 = vst [vmem:[#allocation2 + $0x18] sm:$0x1f] %v509_v51  ;;  %396 = vst [vmem:[#allocation2 + $0x30] sm:$0xf0] %v395_v60  ;;  %v474_v2 = vshll.u32 %v2792_v54, 16  ;;  %v398_v6 = vsel %vm2996_vm5, 0, %v397_v3 }
  0x24   : > { %372 = vst [vmem:[#allocation2 + $0x38] sm:$0x1] %v371_v61  ;;  %513 = vst [vmem:[#allocation2 + $0x20] sm:$0x1f] %v512_v62  ;;  %v469_v8 = vor.u32 %v467_v58, %v466_v63  ;;  %v473_v9 = vrot.slane %v471_v0, 7  ;;  %v478_v14 = vshrl.u32 %v2793_v7, 16  ;;  %2543 = vmatpush3.bf16.msra.mxu0 %v2796_v5  ;;  %2692 = vmatpush3.bf16.msra.mxu1 %v2796_v5 }
  0x25   : > { %399 = vst [vmem:[#allocation2 + $0x38] sm:$0xf0] %v398_v6  ;;  %v373_v10 = vld [vmem:[#allocation2 + $0x40] sm:$0x1]  ;;  %v400_v11 = vld [vmem:[#allocation2 + $0x40] sm:$0xf0]  ;;  %2544 = vmatprep.subr.bf16.mxu0 %v2797_v12  ;;  %2690 = vmatprep.subr.bf16.mxu1 %v2797_v12 }
  0x26   : > { %v514_v13 = vld [vmem:[#allocation2 + $0x28] sm:$0x1f]  ;;  %v481_v15 = vshll.u32 %v2793_v7, 16  ;;  %v374_v16 = vsel %vm2989_vm2, 0, %v373_v10  ;;  %v401_v17 = vsel %vm2996_vm5, 0, %v400_v11  ;;  %v476_v19 = vor.u32 %v474_v2, %v473_v9  ;;  %s2890_s28 = smov 16  }
  0x27   : > { %v515_v18 = vsel %vm3025_vm9, %v469_v8, %v514_v13  ;;  %375 = vst [vmem:[#allocation2 + $0x40] sm:$0x1] %v374_v16  ;;  %402 = vst [vmem:[#allocation2 + $0x40] sm:$0xf0] %v401_v17  ;;  %v2794_v20 = vld [vmem:[%s3009_s15 + $0x1c] ss:$0 sps:$4 sm:$0xff]  }
  0x28   : > { %516 = vst [vmem:[#allocation2 + $0x28] sm:$0x1f] %v515_v18  ;;  %v480_v22 = vrot.slane %v478_v14, 7  ;;  %v485_v4 = vshrl.u32 %v2794_v20, 16  ;;  %v488_v23 = vshll.u32 %v2794_v20, 16  ;;  %s2891_s30 = smov 32   ;;  %2545 = vmatpush3.bf16.msra.mxu0 %v2797_v12  ;;  %2693 = vmatpush3.bf16.msra.mxu1 %v2797_v12 }
  0x29   : > { %v3071_v21 = vld [vmem:[#allocation2 + $0x8] sm:$0xff]  ;;  %v3075_v1 = vld [vmem:[#allocation2 + $0x10] sm:$0xff]  ;;  %v3092_v34 = vld [vmem:[%s3524_s1] sm:$0xff]   ;;  %vm602_vm10 = vcmask 261120   ;;  %vm641_vm11 = vsmask.f32 7424 }
  0x2a   : > { %545 = vrot.lane.b32.xlu0 %v3071_v21, %s2890_s28  ;;  %562 = vrot.lane.b32.xlu1 %v3075_v1, %s2891_s30  ;;  %v517_v24 = vld [vmem:[#allocation2 + $0x30] sm:$0x1f]  ;;  %v483_v25 = vor.u32 %v481_v15, %v480_v22  ;;  %v3079_v26 = vld [vmem:[#allocation2 + $0x18] sm:$0xff]  ;;  %v487_v28 = vrot.slane %v485_v4, 7  ;;  %v535_v40 = vld [vmem:[#allocation2 + $0x48] sm:$0xff]  ;;  %vm719_vm12 = vcmask 392192  }
  0x2b   : > { %v518_v27 = vsel %vm3025_vm9, %v476_v19, %v517_v24  ;;  %v3094_v35 = vld [vmem:[#allocation2 + $0x20] sm:$0xff]  ;;  %2562 = vmatprep.subr.bf16.mxu0 %v3092_v34  ;;  %v536_v41 = vld [vmem:[#allocation2 + $0x50] sm:$0xff]  ;;  %v2799_v9 = vld [vmem:[%s3524_s1 + $0x8] sm:$0xff]   ;;  %vm971_vm13 = vcmask 1046528   ;;  %vm2893_vm14 = vmmov 0   ;;  %vm1426_vm15 = vcmask 1043456  }
  0x2c   : > { %519 = vst [vmem:[#allocation2 + $0x30] sm:$0x1f] %v518_v27  ;;  %v520_v29 = vld [vmem:[#allocation2 + $0x38] sm:$0x1f]  ;;  %v490_v32 = vor.u32 %v488_v23, %v487_v28  ;;  %v526_v42 = vld [vmem:[#allocation2] sm:$0xff]  ;;  %v2800_v19 = vld [vmem:[%s3524_s1 + $0x10] sm:$0xff]  }
  0x2d   : > { %v521_v30 = vsel %vm3025_vm9, %v483_v25, %v520_v29  ;;  %v2801_v27 = vld [vmem:[%s3524_s1 + $0x30] sm:$0xff]   ;;  %vm1422_vm0 = vcmask 64512   ;;  %vm1803_vm1 = vcmask 257024   ;;  %s2480_s11 = sshll.u32 %s2879_s24, 11  ;;  %s2895_s17 = smov [#allocation4]  }
  0x2e   : > { %547 = vrot.lane.b32.xlu0 %v3075_v1, %s2890_s28  ;;  %564 = vrot.lane.b32.xlu1 %v3079_v26, %s2891_s30  ;;  %522 = vst [vmem:[#allocation2 + $0x38] sm:$0x1f] %v521_v30  ;;  %v523_v33 = vld [vmem:[#allocation2 + $0x40] sm:$0x1f]  ;;  %s3461_s14 = scalar_lea.hbm %s3529_s6, %s2480_s11  ;;  %s2813_s18 = sshll.u32 %s2895_s17, 4  ;;  %s2814_s18 = int_to_ptr.vmem [resolvable:$false] %s2813_s18 }
  0x2f   : > { %v524_v36 = vsel %vm3025_vm9, %v490_v32, %v523_v33  ;;  %v3103_v37 = vld [vmem:[#allocation2 + $0x28] sm:$0xff]  ;;  %s2815_s19 = scalar_lea.vmem %s2814_s18, 4096 }
  0x30   : > { %525 = vst [vmem:[#allocation2 + $0x40] sm:$0x1f] %v524_v36 }
  0x32   : > { %549 = vrot.lane.b32.xlu0 %v3079_v26, %s2890_s28  ;;  %566 = vrot.lane.b32.xlu1 %v3094_v35, %s2891_s30 }
  0x33   : > { %v3109_v38 = vld [vmem:[#allocation2 + $0x30] sm:$0xff] }
  0x35   : > { %v3115_v31 = vld [vmem:[#allocation2 + $0x38] sm:$0xff] }
  0x36   : > { %551 = vrot.lane.b32.xlu0 %v3094_v35, %s2890_s28  ;;  %568 = vrot.lane.b32.xlu1 %v3103_v37, %s2891_s30 }
  0x37   : > { %v3121_v39 = vld [vmem:[#allocation2 + $0x40] sm:$0xff] }
  0x3a   : > { %553 = vrot.lane.b32.xlu0 %v3103_v37, %s2890_s28  ;;  %570 = vrot.lane.b32.xlu1 %v3109_v38, %s2891_s30 }
  0x3e   : > { %555 = vrot.lane.b32.xlu0 %v3109_v38, %s2890_s28  ;;  %572 = vrot.lane.b32.xlu1 %v3115_v31, %s2891_s30 }
  0x42   : > { %557 = vrot.lane.b32.xlu0 %v3115_v31, %s2890_s28  ;;  %574 = vrot.lane.b32.xlu1 %v3121_v39, %s2891_s30 }
  0x46   : > { %559 = vrot.lane.b32.xlu0 %v3121_v39, %s2890_s28  ;;  %576 = vrot.lane.b32.xlu1 %v535_v40, %s2891_s30 }
  0x4a   : > { %625 = vrot.lane.b32.xlu0 %v535_v40, %s2890_s28  ;;  %628 = vrot.lane.b32.xlu1 %v536_v41, %s2891_s30  ;;  %s315_s28 = sand.u32 1, %s2871_s22  }
  0x4b   : > { %s2309_s30 = sshll.u32 %s315_s28, 7  ;;  %s3477_s15 = scalar_lea.sflag [#allocation5], %s315_s28 }
  0x4c   : > { %s3394_s8 = scalar_lea.vmem [#allocation4], %s2309_s30 }
  0x4d   : > { %s2171_s12 = sshll.u32 %s3394_s8, 4  ;;  %s3463_s12 = int_to_ptr.vmem [resolvable:$true] %s2171_s12 }
  0x4e   : > { %s2809_s16 = scalar_lea.vmem %s3463_s12, 2048  ;;  %p2816_p1 = scmp.lt.s32.totalorder %s3463_s12, %s2814_s18 }
  0x4f   : > { %p2810_p12 = scmp.ne.s32.totalorder %s3463_s12, %s2809_s16  ;;  %p2817_p2 = scmp.lt.s32.totalorder %s2815_s19, %s2809_s16 }
  0x51   : > { %p2811_p13 = pnand %p2810_p12, %p2973_p4  ;;  %p2818_p3 = por %p2817_p2, %p2816_p1 }
  0x53   : > { %p2812_p0 = pneg %p2811_p13 }
  0x55   : > { %p2819_p5 = pnand %p2818_p3, %p2812_p0 }
  0x9c   : > { %v546_v43 = vpop.permute.xlu0 %545  ;;  %v563_v45 = vpop.permute.xlu1 %562 }
  0x9d   : > { %v580_v44 = vsel %vm343_vm8, %v526_v42, %v546_v43 }
  0x9e   : > { %v3134_v46 = vsel %vm602_vm10, %v580_v44, %v563_v45 }
  0x9f   : > { %v644_v47 = vshll.u32 %v3134_v46, 16  ;;  %v642_v53 = vshrl.u32 %v3134_v46, 16 }
  0xa0   : > { %v548_v48 = vpop.permute.xlu0 %547  ;;  %v565_v51 = vpop.permute.xlu1 %564 }
  0xa1   : > { %v646_v49 = vrot.slane %v644_v47, 1  ;;  %v583_v50 = vsel %vm343_vm8, %v3071_v21, %v548_v48 }
  0xa2   : > { %v3140_v52 = vsel %vm602_vm10, %v583_v50, %v565_v51 }
  0xa3   : > { %v648_v54 = vshll.u32 %v3140_v52, 16  ;;  %v647_v58 = vor.u32 %v646_v49, %v642_v53  ;;  %v652_v63 = vshrl.u32 %v3140_v52, 16 }
  0xa4   : > { %v550_v55 = vpop.permute.xlu0 %549  ;;  %v567_v57 = vpop.permute.xlu1 %566 }
  0xa5   : > { %v586_v56 = vsel %vm343_vm8, %v3075_v1, %v550_v55  ;;  %v650_v59 = vrot.slane %v648_v54, 1 }
  0xa6   : > { %v3147_v60 = vsel %vm602_vm10, %v586_v56, %v567_v57 }
  0xa7   : > { %v655_v61 = vshll.u32 %v3147_v60, 16  ;;  %v651_v62 = vsel %vm641_vm11, %v647_v58, %v650_v59  ;;  %v654_v6 = vor.u32 %v652_v63, %v650_v59  ;;  %v659_v10 = vshrl.u32 %v3147_v60, 16  ;;  %v2802_v63 = vld [vmem:[%s3524_s1 + $0x38] sm:$0xff]  }
  0xa8   : > { %2546 = vmatprep.mubr.msk.bf16.mxu0 %vm719_vm12, %v651_v62  ;;  %v552_v0 = vpop.permute.xlu0 %551  ;;  %v569_v5 = vpop.permute.xlu1 %568 }
  0xa9   : > { %v657_v2 = vrot.slane %v655_v61, 1  ;;  %v589_v3 = vsel %vm343_vm8, %v3079_v26, %v552_v0  ;;  %v2803_v0 = vld [vmem:[%s3524_s1 + $0x40] sm:$0xff]  }
  0xaa   : > { %v3156_v7 = vsel %vm602_vm10, %v589_v3, %v569_v5  ;;  %v972_v3 = vrot.slane %v3134_v46, 1 }
  0xab   : > { %v662_v8 = vshll.u32 %v3156_v7, 16  ;;  %v658_v11 = vsel %vm641_vm11, %v654_v6, %v657_v2  ;;  %v661_v16 = vor.u32 %v659_v10, %v657_v2  ;;  %v666_v20 = vshrl.u32 %v3156_v7, 16 }
  0xac   : > { %v554_v12 = vpop.permute.xlu0 %553  ;;  %2547 = vmatmul.mubr.msk.bf16.vlgmr.msra.gmra.mrb[0].mxu0 %vm719_vm12, %v658_v11  ;;  %v571_v15 = vpop.permute.xlu1 %570  ;;  %v973_v2 = vrot.slane %v3140_v52, 1  ;;  %v975_v6 = vrot.slane %v3147_v60, 1 }
  0xad   : > { %v664_v13 = vrot.slane %v662_v8, 1  ;;  %v592_v14 = vsel %vm343_vm8, %v3094_v35, %v554_v12  ;;  %2563 = vmatpush3.bf16.msra.mxu0 %v3092_v34  ;;  %v977_v8 = vrot.slane %v3156_v7, 1 }
  0xae   : > { %v3168_v17 = vsel %vm602_vm10, %v592_v14, %v571_v15  ;;  %2564 = vmatprep.subr.bf16.mxu0 %v2799_v9  ;;  %v974_v5 = vsel %vm971_vm13, %v972_v3, %v973_v2 }
  0xaf   : > { %v669_v18 = vshll.u32 %v3168_v17, 16  ;;  %v665_v21 = vsel %vm641_vm11, %v661_v16, %v664_v13  ;;  %v668_v24 = vor.u32 %v666_v20, %v664_v13  ;;  %v673_v28 = vshrl.u32 %v3168_v17, 16 }
  0xb0   : > { %v556_v22 = vpop.permute.xlu0 %555  ;;  %2550 = vmatprep.mubr.msk.bf16.mxu0 %vm719_vm12, %v665_v21  ;;  %v573_v23 = vpop.permute.xlu1 %572  ;;  %v978_v10 = vsel %vm971_vm13, %v975_v6, %v977_v8  ;;  %v2892_v20 = vmov 0.0|0.0   ;;  %v1151_v21 = vld [vmem:[%s3527_s4 + $0x10] sm:$0xff] }
  0xb1   : > { %v671_v1 = vrot.slane %v669_v18, 1  ;;  %v595_v4 = vsel %vm343_vm8, %v3103_v37, %v556_v22  ;;  %2565 = vmatpush3.bf16.msra.mxu0 %v2799_v9  ;;  %v976_v9 = vsel %vm971_vm13, %v973_v2, %v975_v6  ;;  %v1150_v18 = vld [vmem:[%s3527_s4 + $0x8] sm:$0xff]  ;;  %2676 = vmatprep.subr.bf16.mxu1 %v2892_v20  ;;  %v1152_v22 = vld [vmem:[%s3527_s4 + $0x18] sm:$0xff] }
  0xb2   : > { %v3181_v25 = vsel %vm602_vm10, %v595_v4, %v573_v23  ;;  %2566 = vmatprep.subr.bf16.mxu0 %v2800_v19  ;;  %v2894_v4 = vmov 0.0  }
  0xb3   : > { %v676_v26 = vshll.u32 %v3181_v25, 16  ;;  %v672_v29 = vsel %vm641_vm11, %v668_v24, %v671_v1  ;;  %v675_v35 = vor.u32 %v673_v28, %v671_v1  ;;  %v680_v37 = vshrl.u32 %v3181_v25, 16 }
  0xb4   : > { %v558_v30 = vpop.permute.xlu0 %557  ;;  %2551 = vmatmul.mubr.msk.bf16.gmra.mrb[4].mxu0 %vm719_vm12, %v672_v29  ;;  %v575_v34 = vpop.permute.xlu1 %574  ;;  %v2680_v1 = vpack.c.bf16 %v1152_v22, %v1151_v21 }
  0xb5   : > { %v678_v32 = vrot.slane %v676_v26, 1  ;;  %v598_v33 = vsel %vm343_vm8, %v3109_v38, %v558_v30  ;;  %2567 = vmatpush3.bf16.msra.mxu0 %v2800_v19 }
  0xb6   : > { %v3193_v36 = vsel %vm602_vm10, %v598_v33, %v575_v34  ;;  %2584 = vmatprep.subr.bf16.mxu0 %v2801_v27 }
  0xb7   : > { %v683_v40 = vshll.u32 %v3193_v36, 16  ;;  %v679_v41 = vsel %vm641_vm11, %v675_v35, %v678_v32  ;;  %v682_v43 = vor.u32 %v680_v37, %v678_v32  ;;  %v687_v49 = vshrl.u32 %v3193_v36, 16 }
  0xb8   : > { %v560_v42 = vpop.permute.xlu0 %559  ;;  %2554 = vmatprep.mubr.msk.bf16.mxu0 %vm719_vm12, %v679_v41  ;;  %v577_v45 = vpop.permute.xlu1 %576 }
  0xb9   : > { %v685_v44 = vrot.slane %v683_v40, 1  ;;  %v601_v38 = vsel %vm343_vm8, %v3115_v31, %v560_v42 }
  0xba   : > { %v618_v47 = vsel %vm602_vm10, %v601_v38, %v577_v45 }
  0xbb   : > { %v686_v48 = vsel %vm641_vm11, %v682_v43, %v685_v44  ;;  %v694_v50 = vshrl.u32 %v618_v47, 16  ;;  %v690_v51 = vshll.u32 %v618_v47, 16  ;;  %v689_v31 = vor.u32 %v687_v49, %v685_v44 }
  0xbc   : > { %v626_v53 = vpop.permute.xlu0 %625  ;;  %2555 = vmatmul.mubr.msk.bf16.gmra.mrb[8].mxu0 %vm719_vm12, %v686_v48  ;;  %v629_v55 = vpop.permute.xlu1 %628  ;;  %v985_v12 = vrot.slane %v618_v47, 1 }
  0xbd   : > { %v632_v54 = vsel %vm343_vm8, %v3121_v39, %v626_v53  ;;  %2568 = vmatprep.mubr.msk.bf16.mxu0 %vm719_vm12, %v3134_v46  ;;  %v692_v56 = vrot.slane %v690_v51, 1  ;;  %v979_v46 = vrot.slane %v3168_v17, 1 }
  0xbe   : > { %v634_v57 = vsel %vm602_vm10, %v632_v54, %v629_v55 }
  0xbf   : > { %v697_v58 = vshll.u32 %v634_v57, 16  ;;  %v693_v59 = vsel %vm641_vm11, %v689_v31, %v692_v56  ;;  %v696_v61 = vor.u32 %v694_v50, %v692_v56  ;;  %v980_v11 = vsel %vm971_vm13, %v977_v8, %v979_v46 }
  0xc0   : > { %2558 = vmatprep.mubr.msk.bf16.mxu1 %vm719_vm12, %v693_v59  ;;  %v987_v15 = vrot.slane %v634_v57, 1  ;;  %v1226_v8 = vlaneseq }
  0xc1   : > { %v699_v62 = vrot.slane %v697_v58, 1 }
  0xc2   : > { %v988_v16 = vsel %vm971_vm13, %v985_v12, %v987_v15 }
  0xc3   : > { %v700_v39 = vsel %vm641_vm11, %v696_v61, %v699_v62 }
  0xc4   : > { %2559 = vmatmul.mubr.msk.bf16.vlgmr.msra.gmra.mrb[0].mxu1 %vm719_vm12, %v700_v39  ;;  %2569 = vmatmul.mubr.msk.bf16.vlgmr.msra.gmra.mrb[0].mxu0 %vm719_vm12, %v3140_v52  ;;  %v981_v52 = vrot.slane %v3181_v25, 1 }
  0xc5   : > { %2572 = vmatprep.mubr.msk.bf16.mxu0 %vm719_vm12, %v3147_v60  ;;  %2585 = vmatpush3.bf16.msra.mxu0 %v2801_v27 }
  0xc6   : > { %2586 = vmatprep.subr.bf16.mxu0 %v2802_v63  ;;  %v982_v60 = vsel %vm971_vm13, %v979_v46, %v981_v52  ;;  %2614 = vmatprep.mubr.msk.f32.mxu1 %vm2893_vm14, %v2894_v4 }
  0xc9   : > { %2587 = vmatpush3.bf16.msra.mxu0 %v2802_v63 }
  0xca   : > { %2588 = vmatprep.subr.bf16.mxu0 %v2803_v0 }
  0xcc   : > { %2573 = vmatmul.mubr.msk.bf16.gmra.mrb[4].mxu0 %vm719_vm12, %v3156_v7  ;;  %v983_v7 = vrot.slane %v3193_v36, 1 }
  0xcd   : > { %2576 = vmatprep.mubr.msk.bf16.mxu0 %vm719_vm12, %v3168_v17  ;;  %2589 = vmatpush3.bf16.msra.mxu0 %v2803_v0  ;;  %v1149_v17 = vld [vmem:[%s3527_s4] sm:$0xff] }
  0xce   : > { %v984_v13 = vsel %vm971_vm13, %v981_v52, %v983_v7  ;;  %v986_v14 = vsel %vm971_vm13, %v983_v7, %v985_v12  ;;  %v2677_v19 = vpack.c.bf16 %v1150_v18, %v1149_v17 }
  0xd0   : > { %2678 = vmatpush3.bf16.msra.mxu1 %v2677_v19 }
  0xd1   : > { %2679 = vmatprep.subr.bf16.mxu1 %v2892_v20 }
  0xd4   : > { %2577 = vmatmul.mubr.msk.bf16.gmra.mrb[8].mxu0 %vm719_vm12, %v3181_v25  ;;  %2681 = vmatpush3.bf16.msra.mxu1 %v2680_v1 }
  0xd5   : > { %2580 = vmatprep.mubr.msk.bf16.mxu0 %vm719_vm12, %v3193_v36  ;;  %2682 = vmatprep.subr.bf16.mxu1 %v2892_v20 }
  0xdc   : > { %2581 = vmatmul.mubr.msk.bf16.gmra.mrb[12].mxu0 %vm719_vm12, %v618_v47 }
  0xdd   : > { %2590 = vmatprep.mubr.msk.bf16.mxu0 %vm719_vm12, %v974_v5 }
  0xe4   : > { %2591 = vmatmul.mubr.msk.bf16.vlgmr.msra.gmra.mrb[0].mxu0 %vm719_vm12, %v976_v9  ;;  %v1227_v9 = vshrl.u32 %v1226_v8, 7 }
  0xe5   : > { %2594 = vmatprep.mubr.msk.bf16.mxu0 %vm719_vm12, %v978_v10 }
  0xe6   : > { %v1228_v10 = vsub.s32 0, %v1227_v9 }
  0xec   : > { %2595 = vmatmul.mubr.msk.bf16.gmra.mrb[4].mxu0 %vm719_vm12, %v980_v11 }
  0xed   : > { %2598 = vmatprep.mubr.msk.bf16.mxu0 %vm719_vm12, %v982_v60 }
  0xf4   : > { %2599 = vmatmul.mubr.msk.bf16.gmra.mrb[8].mxu0 %vm719_vm12, %v984_v13 }
  0xf5   : > { %2602 = vmatprep.mubr.msk.bf16.mxu0 %vm719_vm12, %v986_v14 }
  0xfc   : > { %2603 = vmatmul.mubr.msk.bf16.gmra.mrb[12].mxu0 %vm719_vm12, %v988_v16 }
 0x197   : > { %v2560_v23 = vpop.f32.mrb[0].mxu1 }
 0x198   : > { %v820_v24 = vpop.f32.mrb[1].mxu1 }
 0x199   : > { %v2561_v25 = vpop.f32.mrb[2].mxu1 }
 0x19a   : > { %v823_v26 = vpop.f32.mrb[3].mxu1 }
 0x1b7   : > { %v2592_v27 = vpop.f32.mrb[0].mxu0 }
 0x1b8   : > { %v1129_v28 = vsel %vm602_vm10, %v2592_v27, 0.0  ;;  %v1065_v29 = vpop.f32.mrb[1].mxu0 }
 0x1b9   : > { %v1128_v30 = vsel %vm602_vm10, %v1065_v29, 0.0  ;;  %v2593_v32 = vpop.f32.mrb[2].mxu0 }
 0x1ba   : > { %v1130_v33 = vadd.f32 %v1129_v28, %v1128_v30  ;;  %v1068_v34 = vpop.f32.mrb[3].mxu0 }
 0x1bf   : > { %v2596_v35 = vpop.f32.mrb[4].mxu0 }
 0x1c0   : > { %v1079_v36 = vpop.f32.mrb[5].mxu0  ;;  %v1133_v43 = vsel %vm602_vm10, %v2596_v35, 0.0 }
 0x1c1   : > { %v1131_v37 = vsel %vm602_vm10, %v1079_v36, 0.0  ;;  %v2597_v40 = vpop.f32.mrb[6].mxu0 }
 0x1c2   : > { %v1132_v41 = vadd.f32 %v1131_v37, %v1130_v33  ;;  %v1082_v42 = vpop.f32.mrb[7].mxu0 }
 0x1c4   : > { %v1134_v44 = vadd.f32 %v1133_v43, %v1132_v41 }
 0x1c7   : > { %v2600_v38 = vpop.f32.mrb[8].mxu0 }
 0x1c8   : > { %v1093_v45 = vpop.f32.mrb[9].mxu0  ;;  %v1137_v51 = vsel %vm602_vm10, %v2600_v38, 0.0 }
 0x1c9   : > { %v1135_v47 = vsel %vm602_vm10, %v1093_v45, 0.0  ;;  %v2601_v48 = vpop.f32.mrb[10].mxu0 }
 0x1ca   : > { %v1136_v49 = vadd.f32 %v1135_v47, %v1134_v44  ;;  %v1096_v50 = vpop.f32.mrb[11].mxu0 }
 0x1cc   : > { %v1138_v53 = vadd.f32 %v1137_v51, %v1136_v49 }
 0x1cf   : > { %v2604_v54 = vpop.f32.mrb[12].mxu0 }
 0x1d0   : > { %v2694_v55 = vadd.f32 %v2604_v54, %v2560_v23  ;;  %v1107_v31 = vpop.f32.mrb[13].mxu0 }
 0x1d1   : > { %v2695_v56 = vadd.f32 %v1107_v31, %v820_v24  ;;  %v2605_v57 = vpop.f32.mrb[14].mxu0 }
 0x1d2   : > { %v1110_v58 = vpop.f32.mrb[15].mxu0  ;;  %v1141_v62 = vsel %vm602_vm10, %v2694_v55, 0.0  ;;  %v3317_v57 = vld [vmem:[%s3526_s3] ss:$0 sm:$0xff] }
 0x1d3   : > { %v1139_v59 = vsel %vm602_vm10, %v2695_v56, 0.0 }
 0x1d4   : > { %v1140_v61 = vadd.f32 %v1139_v59, %v1138_v53 }
 0x1d6   : > { %v1142_v63 = vadd.f32 %v1141_v62, %v1140_v61 }
 0x1d8   : > { %v1143_v39 = vrot.slane %v1142_v63, 4 }
 0x1da   : > { %v1144_v0 = vadd.f32 %v1143_v39, %v1142_v63 }
 0x1dc   : > { %v1145_v2 = vrot.slane %v1144_v0, 2 }
 0x1de   : > { %v1146_v3 = vadd.f32 %v1145_v2, %v1144_v0 }
 0x1e0   : > { %v1147_v5 = vrot.slane %v1146_v3, 1 }
 0x1e2   : > { %v1148_v6 = vadd.f32 %v1147_v5, %v1146_v3 }
 0x1e4   : > { %2615 = vmatmul.mubr.msk.f32.vlgmr.msra.gmra.mrb[4].mxu1 %vm602_vm10, %v1148_v6  ;;  %v3328_v6 = vld [vmem:[%s3528_s5] sm:$0xff]  }
 0x1e5   : > { %2684 = vmatpush3.bf16.msra.mxu1 %v2677_v19  ;;  %2625 = vmatprep.mubr.msk.f32.mxu1 %vm2893_vm14, %v2894_v4 }
 0x1e6   : > { %2685 = vmatprep.subr.bf16.mxu1 %v2892_v20 }
 0x1e9   : > { %2687 = vmatpush3.bf16.msra.mxu1 %v2680_v1 }
 0x1ea   : > { %2628 = vmatprep.subr.bf16.mxu1 %v2894_v4 }
 0x2b7   : > { %v1222_v46 = vpop.f32.mrb[4].mxu1 }
 0x2b8   : > { %v1229_v52 = vrot.slane %v1222_v46, %v1228_v10  ;;  %v2616_v11 = vpop.f32.mrb[5].mxu1 }
 0x2ba   : > { %v1230_v60 = vsub.f32 %v1065_v29, %v1229_v52  ;;  %v1231_v7 = vsub.f32 %v2592_v27, %v1229_v52  ;;  %v1232_v12 = vsub.f32 %v1079_v36, %v1229_v52  ;;  %v1233_v13 = vsub.f32 %v2596_v35, %v1229_v52 }
 0x2bb   : > { %v3282_v14 = vsub.f32 %v1093_v45, %v1229_v52  ;;  %v3284_v15 = vsub.f32 %v2600_v38, %v1229_v52  ;;  %v3288_v1 = vsub.f32 %v2695_v56, %v1229_v52  ;;  %v3293_v26 = vsub.f32 %v2694_v55, %v1229_v52  ;;  %v3312_v55 = vld [vmem:[%s3525_s2] ss:$0 sm:$0xff] }
 0x2bc   : > { %v1238_v16 = vmul.f32 %v1230_v60, %v1230_v60  ;;  %v1239_v17 = vmul.f32 %v1231_v7, %v1231_v7  ;;  %v1240_v18 = vmul.f32 %v1232_v12, %v1232_v12  ;;  %v1241_v19 = vmul.f32 %v1233_v13, %v1233_v13 }
 0x2bd   : > { %v1242_v23 = vmul.f32 %v3282_v14, %v3282_v14  ;;  %v1243_v27 = vmul.f32 %v3284_v15, %v3284_v15  ;;  %v1244_v30 = vmul.f32 %v3288_v1, %v3288_v1  ;;  %v1245_v34 = vmul.f32 %v3293_v26, %v3293_v26 }
 0x2be   : > { %v1246_v20 = vsel %vm602_vm10, %v1238_v16, 0.0  ;;  %v1247_v21 = vsel %vm602_vm10, %v1239_v17, 0.0  ;;  %v1249_v24 = vsel %vm602_vm10, %v1240_v18, 0.0  ;;  %v1251_v28 = vsel %vm602_vm10, %v1241_v19, 0.0 }
 0x2bf   : > { %v1248_v22 = vadd.f32 %v1247_v21, %v1246_v20  ;;  %v1253_v32 = vsel %vm602_vm10, %v1242_v23, 0.0  ;;  %v1255_v35 = vsel %vm602_vm10, %v1243_v27, 0.0  ;;  %v1257_v37 = vsel %vm602_vm10, %v1244_v30, 0.0 }
 0x2c0   : > { %v1259_v41 = vsel %vm602_vm10, %v1245_v34, 0.0 }
 0x2c1   : > { %v1250_v25 = vadd.f32 %v1249_v24, %v1248_v22 }
 0x2c3   : > { %v1252_v29 = vadd.f32 %v1251_v28, %v1250_v25 }
 0x2c5   : > { %v1254_v33 = vadd.f32 %v1253_v32, %v1252_v29 }
 0x2c7   : > { %v1256_v36 = vadd.f32 %v1255_v35, %v1254_v33 }
 0x2c9   : > { %v1258_v40 = vadd.f32 %v1257_v37, %v1256_v36 }
 0x2cb   : > { %v1260_v42 = vadd.f32 %v1259_v41, %v1258_v40 }
 0x2cd   : > { %v1261_v43 = vrot.slane %v1260_v42, 4 }
 0x2cf   : > { %v1262_v44 = vadd.f32 %v1261_v43, %v1260_v42 }
 0x2d1   : > { %v1263_v38 = vrot.slane %v1262_v44, 2 }
 0x2d3   : > { %v1264_v45 = vadd.f32 %v1263_v38, %v1262_v44 }
 0x2d5   : > { %v1265_v47 = vrot.slane %v1264_v45, 1 }
 0x2d7   : > { %v1266_v48 = vadd.f32 %v1265_v47, %v1264_v45 }
 0x2d9   : > { %2626 = vmatmul.mubr.msk.f32.vlgmr.msra.gmra.mrb[6].mxu1 %vm602_vm10, %v1266_v48 }
 0x2da   : > { %2630 = vmatprep.mubr.msk.bf16.mxu1 %vm2893_vm14, %v2894_v4 }
 0x3ac   : > { %v1336_v49 = vpop.f32.mrb[6].mxu1 }
 0x3ad   : > { %v1337_v50 = vadd.f32 1e-05, %v1336_v49  ;;  %v2627_v51 = vpop.f32.mrb[7].mxu1 }
 0x3af   : > { %2807 = vrsqrt.f32 %v1337_v50 }
 0x3b9   : > { %v2808_v53 = vpop.eup %2807 }
 0x3ba   : > { %v1344_v54 = vrot.slane %v2808_v53, %v1228_v10 }
 0x3bc   : > { %v1345_v31 = vmul.f32 %v1344_v54, %v1230_v60  ;;  %v1346_v56 = vmul.f32 %v1344_v54, %v1231_v7  ;;  %v1347_v61 = vmul.f32 %v1344_v54, %v1232_v12  ;;  %v1348_v10 = vmul.f32 %v1344_v54, %v1233_v13 }
 0x3bd   : > { %v1349_v12 = vmul.f32 %v1344_v54, %v3282_v14  ;;  %v1350_v20 = vmul.f32 %v1344_v54, %v3284_v15  ;;  %v1351_v25 = vmul.f32 %v1344_v54, %v3288_v1  ;;  %v1352_v32 = vmul.f32 %v1344_v54, %v3293_v26 }
 0x3be   : > { %v1360_v58 = vmul.f32 %v3312_v55, %v1345_v31  ;;  %v1361_v59 = vmul.f32 %v3312_v55, %v1346_v56  ;;  %v1362_v2 = vmul.f32 %v3312_v55, %v1347_v61  ;;  %v1363_v11 = vmul.f32 %v3312_v55, %v1348_v10 }
 0x3bf   : > { %v1364_v17 = vmul.f32 %v3312_v55, %v1349_v12  ;;  %v1365_v22 = vmul.f32 %v3312_v55, %v1350_v20  ;;  %v1366_v28 = vmul.f32 %v3312_v55, %v1351_v25  ;;  %v1367_v34 = vmul.f32 %v3312_v55, %v1352_v32 }
 0x3c0   : > { %v1375_v62 = vadd.f32 %v3317_v57, %v1360_v58  ;;  %v1376_v63 = vadd.f32 %v3317_v57, %v1361_v59  ;;  %v1377_v9 = vadd.f32 %v3317_v57, %v1362_v2  ;;  %v1378_v7 = vadd.f32 %v3317_v57, %v1363_v11 }
 0x3c1   : > { %v1379_v19 = vadd.f32 %v3317_v57, %v1364_v17  ;;  %v1380_v24 = vadd.f32 %v3317_v57, %v1365_v22  ;;  %v1381_v30 = vadd.f32 %v3317_v57, %v1366_v28  ;;  %v1382_v36 = vadd.f32 %v3317_v57, %v1367_v34 }
 0x3c2   : > { %v1383_v39 = vmax.f32 %v1375_v62, 0.0  ;;  %v1384_v0 = vmax.f32 %v1376_v63, 0.0  ;;  %v1385_v52 = vmax.f32 %v1377_v9, 0.0  ;;  %v1386_v16 = vmax.f32 %v1378_v7, 0.0 }
 0x3c3   : > { %v1387_v21 = vmax.f32 %v1379_v19, 0.0  ;;  %v1388_v27 = vmax.f32 %v1380_v24, 0.0  ;;  %v1389_v33 = vmax.f32 %v1381_v30, 0.0  ;;  %v1390_v37 = vmax.f32 %v1382_v36, 0.0 }
 0x3c4   : > { %v2442_v3 = vpack.c.bf16 %v1383_v39, %v1383_v39  ;;  %v2443_v8 = vpack.c.bf16 %v1384_v0, %v1384_v0  ;;  %v2444_v60 = vpack.c.bf16 %v1385_v52, %v1385_v52  ;;  %v2445_v18 = vpack.c.bf16 %v1386_v16, %v1386_v16 }
 0x3c5   : > { %v2446_v23 = vpack.c.bf16 %v1387_v21, %v1387_v21  ;;  %v2447_v29 = vpack.c.bf16 %v1388_v27, %v1388_v27  ;;  %v2448_v35 = vpack.c.bf16 %v1389_v33, %v1389_v33  ;;  %v2449_v40 = vpack.c.bf16 %v1390_v37, %v1390_v37 }
 0x3c6   : > { %v1428_v5 = vsel %vm1426_vm15, %v2442_v3, 0  ;;  %v1472_v46 = vsel %vm1426_vm15, %v2443_v8, 0  ;;  %v1516_v13 = vsel %vm1426_vm15, %v2444_v60, 0  ;;  %v1560_v14 = vsel %vm1426_vm15, %v2445_v18, 0 }
 0x3c7   : > { %2629 = vmatpush3.bf16.msra.mxu1 %v1428_v5  ;;  %v1604_v15 = vsel %vm1426_vm15, %v2446_v23, 0  ;;  %v1648_v1 = vsel %vm1426_vm15, %v2447_v29, 0  ;;  %v1692_v26 = vsel %vm1426_vm15, %v2448_v35, 0  ;;  %v1736_v41 = vsel %vm1426_vm15, %v2449_v40, 0 }
 0x3c8   : > { %2634 = vmatprep.subr.bf16.mxu1 %v2894_v4 }
 0x3ca   : > { %2631 = vmatmul.mubr.msk.bf16.vlgmr.msra.gmra.mrb[8].mxu1 %vm1422_vm0, %v3328_v6 }
 0x3cb   : > { %2635 = vmatpush3.bf16.msra.mxu1 %v1472_v46  ;;  %2636 = vmatprep.mubr.msk.bf16.mxu1 %vm2893_vm14, %v2894_v4 }
 0x3cc   : > { %2640 = vmatprep.subr.bf16.mxu1 %v2894_v4 }
 0x3d2   : > { %2637 = vmatmul.mubr.msk.bf16.vlgmr.msra.gmra.mrb[12].mxu1 %vm1422_vm0, %v3328_v6 }
 0x3d3   : > { %2641 = vmatpush3.bf16.msra.mxu1 %v1516_v13  ;;  %2642 = vmatprep.mubr.msk.bf16.mxu1 %vm2893_vm14, %v2894_v4 }
 0x3d4   : > { %2646 = vmatprep.subr.bf16.mxu1 %v2894_v4 }
 0x3da   : > { %2643 = vmatmul.mubr.msk.bf16.vlgmr.msra.gmra.mrb[16].mxu1 %vm1422_vm0, %v3328_v6 }
 0x3db   : > { %2647 = vmatpush3.bf16.msra.mxu1 %v1560_v14  ;;  %2648 = vmatprep.mubr.msk.bf16.mxu1 %vm2893_vm14, %v2894_v4 }
 0x3dc   : > { %2652 = vmatprep.subr.bf16.mxu1 %v2894_v4 }
 0x3e2   : > { %2649 = vmatmul.mubr.msk.bf16.vlgmr.msra.gmra.mrb[20].mxu1 %vm1422_vm0, %v3328_v6 }
 0x3e3   : > { %2653 = vmatpush3.bf16.msra.mxu1 %v1604_v15  ;;  %2654 = vmatprep.mubr.msk.bf16.mxu1 %vm2893_vm14, %v2894_v4 }
 0x3e4   : > { %2658 = vmatprep.subr.bf16.mxu1 %v2894_v4 }
 0x3ea   : > { %2655 = vmatmul.mubr.msk.bf16.vlgmr.msra.gmra.mrb[24].mxu1 %vm1422_vm0, %v3328_v6 }
 0x3eb   : > { %2659 = vmatpush3.bf16.msra.mxu1 %v1648_v1  ;;  %2660 = vmatprep.mubr.msk.bf16.mxu1 %vm2893_vm14, %v2894_v4 }
 0x3ec   : > { %2664 = vmatprep.subr.bf16.mxu1 %v2894_v4 }
 0x3f2   : > { %2661 = vmatmul.mubr.msk.bf16.vlgmr.msra.gmra.mrb[28].mxu1 %vm1422_vm0, %v3328_v6 }
 0x3f3   : > { %2665 = vmatpush3.bf16.msra.mxu1 %v1692_v26  ;;  %2666 = vmatprep.mubr.msk.bf16.mxu1 %vm2893_vm14, %v2894_v4 }
 0x3f4   : > { %2670 = vmatprep.subr.bf16.mxu1 %v2894_v4 }
 0x3fa   : > { %2667 = vmatmul.mubr.msk.bf16.vlgmr.msra.gmra.mrb[32].mxu1 %vm1422_vm0, %v3328_v6 }
 0x3fb   : > { %2671 = vmatpush3.bf16.msra.mxu1 %v1736_v41  ;;  %2672 = vmatprep.mubr.msk.bf16.mxu1 %vm2893_vm14, %v2894_v4 }
 0x402   : > { %2673 = vmatmul.mubr.msk.bf16.vlgmr.msra.gmra.mrb[36].mxu1 %vm1422_vm0, %v3328_v6 }
 0x49d   : > { %v1464_v42 = vpop.f32.mrb[8].mxu1 }
 0x49e   : > { %v2632_v43 = vpop.f32.mrb[9].mxu1 }
 0x49f   : > { %v1467_v44 = vpop.f32.mrb[10].mxu1 }
 0x4a0   : > { %v1779_v38 = vpack.c.bf16 %v1467_v44, %v1464_v42  ;;  %v2633_v45 = vpop.f32.mrb[11].mxu1 }
 0x4a2   : > { %1787 = vst.msk [vmem:[#allocation3] sm:$0xff] %vm602_vm10, %v1779_v38 }
 0x4a5   : > { %v1508_v47 = vpop.f32.mrb[12].mxu1 }
 0x4a6   : > { %v2638_v48 = vpop.f32.mrb[13].mxu1 }
 0x4a7   : > { %v1511_v49 = vpop.f32.mrb[14].mxu1 }
 0x4a8   : > { %v1780_v50 = vpack.c.bf16 %v1511_v49, %v1508_v47  ;;  %v2639_v51 = vpop.f32.mrb[15].mxu1 }
 0x4a9   : > { %v1795_v53 = vld [vmem:[#allocation3] sm:$0xff] }
 0x4aa   : > { %v2374_v4 = vcombine.low %v1795_v53, %v1795_v53  ;;  %v2375_v54 = vcombine.high %v1795_v53, %v1795_v53  ;;  %1788 = vst.msk [vmem:[#allocation3 + $0x8] sm:$0xff] %vm602_vm10, %v1780_v50  ;;  %v1807_v56 = vunpack.c.l.bf16 %v1795_v53  ;;  %v1808_v57 = vunpack.c.h.bf16 %v1795_v53 }
 0x4ac   : > { %1804 = vst.msk [vmem:[%s3394_s8] sm:$0xf] %vm1803_vm1, %v2374_v4  ;;  %1805 = vst.msk [vmem:[%s3394_s8 + $0x4] sm:$0xf] %vm1803_vm1, %v2375_v54  ;;  %v1809_v0 = vmul.f32 0.53333336, %v1807_v56 }
 0x4ad   : > { %v1552_v55 = vpop.f32.mrb[16].mxu1  ;;  %v1810_v2 = vmul.f32 0.53333336, %v1808_v57  ;;  %v1833_v3 = vmul.f32 0.06666667, %v1807_v56 }
 0x4ae   : > { %v2644_v31 = vpop.f32.mrb[17].mxu1  ;;  %v1834_v9 = vmul.f32 0.06666667, %v1808_v57 }
 0x4af   : > { %v1555_v58 = vpop.f32.mrb[18].mxu1 }
 0x4b0   : > { %v1781_v59 = vpack.c.bf16 %v1555_v58, %v1552_v55  ;;  %v2645_v61 = vpop.f32.mrb[19].mxu1 }
 0x4b1   : > { %v1812_v62 = vld [vmem:[#allocation3 + $0x8] sm:$0xff] }
 0x4b2   : > { %v1813_v63 = vunpack.c.l.bf16 %v1812_v62  ;;  %v1814_v39 = vunpack.c.h.bf16 %v1812_v62  ;;  %1789 = vst.msk [vmem:[#allocation3 + $0x10] sm:$0xff] %vm602_vm10, %v1781_v59 }
 0x4b4   : > { %v1815_v5 = vmul.f32 0.46666667, %v1813_v63  ;;  %v1816_v6 = vmul.f32 0.46666667, %v1814_v39  ;;  %v1838_v8 = vmul.f32 0.93333334, %v1813_v63 }
 0x4b5   : > { %v1839_v10 = vmul.f32 0.93333334, %v1814_v39  ;;  %v1596_v60 = vpop.f32.mrb[20].mxu1  ;;  %v1856_v24 = vmul.f32 0.6, %v1813_v63 }
 0x4b6   : > { %v1817_v46 = vadd.f32 %v1815_v5, %v1809_v0  ;;  %v1818_v52 = vadd.f32 %v1816_v6, %v1810_v2  ;;  %v1840_v11 = vadd.f32 %v1838_v8, %v1833_v3  ;;  %v2650_v12 = vpop.f32.mrb[21].mxu1  ;;  %v1857_v25 = vmul.f32 0.6, %v1814_v39 }
 0x4b7   : > { %v1841_v7 = vadd.f32 %v1839_v10, %v1834_v9  ;;  %v1599_v18 = vpop.f32.mrb[22].mxu1  ;;  %v1880_v15 = vmul.f32 0.13333334, %v1813_v63  ;;  %v1881_v30 = vmul.f32 0.13333334, %v1814_v39 }
 0x4b8   : > { %v2450_v13 = vpack.c.bf16 %v1817_v46, %v1817_v46  ;;  %v2451_v16 = vpack.c.bf16 %v1818_v52, %v1818_v52  ;;  %v2452_v17 = vpack.c.bf16 %v1840_v11, %v1840_v11  ;;  %v1782_v14 = vpack.c.bf16 %v1599_v18, %v1596_v60  ;;  %v2651_v21 = vpop.f32.mrb[23].mxu1 }
 0x4b9   : > { %v2453_v19 = vpack.c.bf16 %v1841_v7, %v1841_v7  ;;  %v1859_v20 = vld [vmem:[#allocation3 + $0x10] sm:$0xff] }
 0x4ba   : > { %2378 = vst.msk [vmem:[%s3394_s8 + $0x8] sm:$0xf] %vm1803_vm1, %v2450_v13  ;;  %2379 = vst.msk [vmem:[%s3394_s8 + $0xc] sm:$0xf] %vm1803_vm1, %v2451_v16  ;;  %v1860_v22 = vunpack.c.l.bf16 %v1859_v20  ;;  %v1861_v23 = vunpack.c.h.bf16 %v1859_v20 }
 0x4bb   : > { %2382 = vst.msk [vmem:[%s3394_s8 + $0x10] sm:$0xf] %vm1803_vm1, %v2452_v17  ;;  %2383 = vst.msk [vmem:[%s3394_s8 + $0x14] sm:$0xf] %vm1803_vm1, %v2453_v19 }
 0x4bc   : > { %1790 = vst.msk [vmem:[#allocation3 + $0x18] sm:$0xff] %vm602_vm10, %v1782_v14  ;;  %v1862_v27 = vmul.f32 0.4, %v1860_v22  ;;  %v1863_v28 = vmul.f32 0.4, %v1861_v23 }
 0x4bd   : > { %v1885_v29 = vmul.f32 0.8666667, %v1860_v22  ;;  %v1886_v32 = vmul.f32 0.8666667, %v1861_v23  ;;  %v1640_v35 = vpop.f32.mrb[24].mxu1 }
 0x4be   : > { %v1864_v1 = vadd.f32 %v1862_v27, %v1856_v24  ;;  %v1865_v33 = vadd.f32 %v1863_v28, %v1857_v25  ;;  %v2656_v26 = vpop.f32.mrb[25].mxu1  ;;  %v1903_v49 = vmul.f32 0.6666667, %v1860_v22  ;;  %v1904_v50 = vmul.f32 0.6666667, %v1861_v23 }
 0x4bf   : > { %v1887_v34 = vadd.f32 %v1885_v29, %v1880_v15  ;;  %v1888_v36 = vadd.f32 %v1886_v32, %v1881_v30  ;;  %v1643_v42 = vpop.f32.mrb[26].mxu1  ;;  %v1927_v51 = vmul.f32 0.2, %v1860_v22  ;;  %v1928_v55 = vmul.f32 0.2, %v1861_v23 }
 0x4c0   : > { %v2454_v37 = vpack.c.bf16 %v1864_v1, %v1864_v1  ;;  %v2455_v40 = vpack.c.bf16 %v1865_v33, %v1865_v33  ;;  %v1783_v44 = vpack.c.bf16 %v1643_v42, %v1640_v35  ;;  %v2657_v38 = vpop.f32.mrb[27].mxu1 }
 0x4c1   : > { %v2456_v41 = vpack.c.bf16 %v1887_v34, %v1887_v34  ;;  %v2457_v43 = vpack.c.bf16 %v1888_v36, %v1888_v36 }
 0x4c2   : > { %2386 = vst.msk [vmem:[%s3394_s8 + $0x18] sm:$0xf] %vm1803_vm1, %v2454_v37  ;;  %2387 = vst.msk [vmem:[%s3394_s8 + $0x1c] sm:$0xf] %vm1803_vm1, %v2455_v40 }
 0x4c3   : > { %2390 = vst.msk [vmem:[%s3394_s8 + $0x20] sm:$0xf] %vm1803_vm1, %v2456_v41  ;;  %v1906_v45 = vld [vmem:[#allocation3 + $0x18] sm:$0xff]  ;;  %2391 = vst.msk [vmem:[%s3394_s8 + $0x24] sm:$0xf] %vm1803_vm1, %v2457_v43 }
 0x4c4   : > { %v1907_v47 = vunpack.c.l.bf16 %v1906_v45  ;;  %v1908_v48 = vunpack.c.h.bf16 %v1906_v45  ;;  %1791 = vst.msk [vmem:[#allocation3 + $0x20] sm:$0xff] %vm602_vm10, %v1783_v44 }
 0x4c5   : > { %v1684_v59 = vpop.f32.mrb[28].mxu1 }
 0x4c6   : > { %v1909_v53 = vmul.f32 0.33333334, %v1907_v47  ;;  %v1910_v4 = vmul.f32 0.33333334, %v1908_v48  ;;  %v1932_v54 = vmul.f32 0.8, %v1907_v47 }
 0x4c7   : > { %v1933_v31 = vmul.f32 0.8, %v1908_v48  ;;  %v2662_v62 = vpop.f32.mrb[29].mxu1  ;;  %v1950_v46 = vmul.f32 0.73333335, %v1907_v47 }
 0x4c8   : > { %v1911_v56 = vadd.f32 %v1909_v53, %v1903_v49  ;;  %v1912_v57 = vadd.f32 %v1910_v4, %v1904_v50  ;;  %v1934_v58 = vadd.f32 %v1932_v54, %v1927_v51  ;;  %v1687_v2 = vpop.f32.mrb[30].mxu1  ;;  %v1951_v52 = vmul.f32 0.73333335, %v1908_v48 }
 0x4c9   : > { %v1935_v61 = vadd.f32 %v1933_v31, %v1928_v55  ;;  %v1784_v6 = vpack.c.bf16 %v1687_v2, %v1684_v59  ;;  %v2663_v8 = vpop.f32.mrb[31].mxu1  ;;  %v1974_v11 = vmul.f32 0.26666668, %v1907_v47  ;;  %v1975_v13 = vmul.f32 0.26666668, %v1908_v48 }
 0x4ca   : > { %v2458_v63 = vpack.c.bf16 %v1911_v56, %v1911_v56  ;;  %v2459_v39 = vpack.c.bf16 %v1912_v57, %v1912_v57  ;;  %v2460_v0 = vpack.c.bf16 %v1934_v58, %v1934_v58 }
 0x4cb   : > { %v2461_v3 = vpack.c.bf16 %v1935_v61, %v1935_v61  ;;  %v1953_v5 = vld [vmem:[#allocation3 + $0x20] sm:$0xff]  ;;  %1792 = vst.msk [vmem:[#allocation3 + $0x28] sm:$0xff] %vm602_vm10, %v1784_v6 }
 0x4cc   : > { %2394 = vst.msk [vmem:[%s3394_s8 + $0x28] sm:$0xf] %vm1803_vm1, %v2458_v63  ;;  %2395 = vst.msk [vmem:[%s3394_s8 + $0x2c] sm:$0xf] %vm1803_vm1, %v2459_v39  ;;  %v1954_v9 = vunpack.c.l.bf16 %v1953_v5  ;;  %v1955_v10 = vunpack.c.h.bf16 %v1953_v5 }
 0x4cd   : > { %2398 = vst.msk [vmem:[%s3394_s8 + $0x30] sm:$0xf] %vm1803_vm1, %v2460_v0  ;;  %2399 = vst.msk [vmem:[%s3394_s8 + $0x34] sm:$0xf] %vm1803_vm1, %v2461_v3  ;;  %v1728_v20 = vpop.f32.mrb[32].mxu1 }
 0x4ce   : > { %v1956_v60 = vmul.f32 0.26666668, %v1954_v9  ;;  %v1957_v7 = vmul.f32 0.26666668, %v1955_v10  ;;  %v1979_v12 = vmul.f32 0.73333335, %v1954_v9 }
 0x4cf   : > { %v1980_v16 = vmul.f32 0.73333335, %v1955_v10  ;;  %v2668_v21 = vpop.f32.mrb[33].mxu1  ;;  %v1997_v30 = vmul.f32 0.8, %v1954_v9 }
 0x4d0   : > { %v1958_v17 = vadd.f32 %v1956_v60, %v1950_v46  ;;  %v1959_v18 = vadd.f32 %v1957_v7, %v1951_v52  ;;  %v1981_v19 = vadd.f32 %v1979_v12, %v1974_v11  ;;  %v1731_v25 = vpop.f32.mrb[34].mxu1  ;;  %v1998_v33 = vmul.f32 0.8, %v1955_v10 }
 0x4d1   : > { %v1982_v14 = vadd.f32 %v1980_v16, %v1975_v13  ;;  %v1785_v27 = vpack.c.bf16 %v1731_v25, %v1728_v20  ;;  %v2669_v28 = vpop.f32.mrb[35].mxu1  ;;  %v2021_v34 = vmul.f32 0.33333334, %v1954_v9  ;;  %v2022_v40 = vmul.f32 0.33333334, %v1955_v10 }
 0x4d2   : > { %v2462_v22 = vpack.c.bf16 %v1958_v17, %v1958_v17  ;;  %v2463_v23 = vpack.c.bf16 %v1959_v18, %v1959_v18  ;;  %v2464_v24 = vpack.c.bf16 %v1981_v19, %v1981_v19  ;;  %v2000_v29 = vld [vmem:[#allocation3 + $0x28] sm:$0xff] }
 0x4d3   : > { %v2465_v15 = vpack.c.bf16 %v1982_v14, %v1982_v14  ;;  %v2001_v32 = vunpack.c.l.bf16 %v2000_v29  ;;  %v2002_v1 = vunpack.c.h.bf16 %v2000_v29  ;;  %1793 = vst.msk [vmem:[#allocation3 + $0x30] sm:$0xff] %vm602_vm10, %v1785_v27 }
 0x4d4   : > { %2402 = vst.msk [vmem:[%s3394_s8 + $0x38] sm:$0xf] %vm1803_vm1, %v2462_v22  ;;  %2403 = vst.msk [vmem:[%s3394_s8 + $0x3c] sm:$0xf] %vm1803_vm1, %v2463_v23 }
 0x4d5   : > { %2406 = vst.msk [vmem:[%s3394_s8 + $0x40] sm:$0xf] %vm1803_vm1, %v2464_v24  ;;  %2407 = vst.msk [vmem:[%s3394_s8 + $0x44] sm:$0xf] %vm1803_vm1, %v2465_v15  ;;  %v1772_v35 = vpop.f32.mrb[36].mxu1 }
 0x4d6   : > { %v2003_v36 = vmul.f32 0.2, %v2001_v32  ;;  %v2004_v26 = vmul.f32 0.2, %v2002_v1  ;;  %v2026_v37 = vmul.f32 0.6666667, %v2001_v32 }
 0x4d7   : > { %v2027_v41 = vmul.f32 0.6666667, %v2002_v1  ;;  %v2674_v38 = vpop.f32.mrb[37].mxu1  ;;  %v2044_v56 = vmul.f32 0.8666667, %v2001_v32 }
 0x4d8   : > { %v2005_v42 = vadd.f32 %v2003_v36, %v1997_v30  ;;  %v2006_v43 = vadd.f32 %v2004_v26, %v1998_v33  ;;  %v2028_v44 = vadd.f32 %v2026_v37, %v2021_v34  ;;  %v1775_v47 = vpop.f32.mrb[38].mxu1  ;;  %v2045_v57 = vmul.f32 0.8666667, %v2002_v1 }
 0x4d9   : > { %v2029_v45 = vadd.f32 %v2027_v41, %v2022_v40  ;;  %v1786_v51 = vpack.c.bf16 %v1775_v47, %v1772_v35  ;;  %v2675_v53 = vpop.f32.mrb[39].mxu1  ;;  %v2068_v58 = vmul.f32 0.4, %v2001_v32  ;;  %v2069_v63 = vmul.f32 0.4, %v2002_v1 }
 0x4da   : > { %v2466_v48 = vpack.c.bf16 %v2005_v42, %v2005_v42  ;;  %v2467_v49 = vpack.c.bf16 %v2006_v43, %v2006_v43  ;;  %v2468_v50 = vpack.c.bf16 %v2028_v44, %v2028_v44  ;;  %v2047_v54 = vld [vmem:[#allocation3 + $0x30] sm:$0xff] }
 0x4db   : > { %v2469_v4 = vpack.c.bf16 %v2029_v45, %v2029_v45  ;;  %v2048_v55 = vunpack.c.l.bf16 %v2047_v54  ;;  %v2049_v31 = vunpack.c.h.bf16 %v2047_v54  ;;  %1794 = vst.msk [vmem:[#allocation3 + $0x38] sm:$0xff] %vm602_vm10, %v1786_v51 }
 0x4dc   : > { %2410 = vst.msk [vmem:[%s3394_s8 + $0x48] sm:$0xf] %vm1803_vm1, %v2466_v48  ;;  %2411 = vst.msk [vmem:[%s3394_s8 + $0x4c] sm:$0xf] %vm1803_vm1, %v2467_v49 }
 0x4dd   : > { %2414 = vst.msk [vmem:[%s3394_s8 + $0x50] sm:$0xf] %vm1803_vm1, %v2468_v50  ;;  %2415 = vst.msk [vmem:[%s3394_s8 + $0x54] sm:$0xf] %vm1803_vm1, %v2469_v4  ;;  %v2050_v59 = vmul.f32 0.13333334, %v2048_v55 }
 0x4de   : > { %v2051_v61 = vmul.f32 0.13333334, %v2049_v31  ;;  %v2073_v62 = vmul.f32 0.6, %v2048_v55  ;;  %v2074_v39 = vmul.f32 0.6, %v2049_v31 }
 0x4df   : > { %v2052_v0 = vadd.f32 %v2050_v59, %v2044_v56  ;;  %v2091_v52 = vmul.f32 0.93333334, %v2048_v55  ;;  %v2138_v11 = vmul.f32 0.0, %v2048_v55  ;;  %v2092_v12 = vmul.f32 0.93333334, %v2049_v31 }
 0x4e0   : > { %v2053_v2 = vadd.f32 %v2051_v61, %v2045_v57  ;;  %v2075_v3 = vadd.f32 %v2073_v62, %v2068_v58  ;;  %v2076_v5 = vadd.f32 %v2074_v39, %v2069_v63  ;;  %v2115_v13 = vmul.f32 0.46666667, %v2048_v55 }
 0x4e1   : > { %v2470_v6 = vpack.c.bf16 %v2052_v0, %v2052_v0  ;;  %v2139_v16 = vmul.f32 0.0, %v2049_v31  ;;  %v2116_v14 = vmul.f32 0.46666667, %v2049_v31 }
 0x4e2   : > { %v2471_v8 = vpack.c.bf16 %v2053_v2, %v2053_v2  ;;  %v2472_v9 = vpack.c.bf16 %v2075_v3, %v2075_v3  ;;  %v2473_v10 = vpack.c.bf16 %v2076_v5, %v2076_v5  ;;  %v2094_v46 = vld [vmem:[#allocation3 + $0x38] sm:$0xff] }
 0x4e3   : > { %2418 = vst.msk [vmem:[%s3394_s8 + $0x58] sm:$0xf] %vm1803_vm1, %v2470_v6  ;;  %v2095_v60 = vunpack.c.l.bf16 %v2094_v46  ;;  %v2096_v7 = vunpack.c.h.bf16 %v2094_v46 }
 0x4e4   : > { %2419 = vst.msk [vmem:[%s3394_s8 + $0x5c] sm:$0xf] %vm1803_vm1, %v2471_v8  ;;  %2422 = vst.msk [vmem:[%s3394_s8 + $0x60] sm:$0xf] %vm1803_vm1, %v2472_v9 }
 0x4e5   : > { %2423 = vst.msk [vmem:[%s3394_s8 + $0x64] sm:$0xf] %vm1803_vm1, %v2473_v10  ;;  %v2097_v17 = vmul.f32 0.06666667, %v2095_v60  ;;  %v2098_v18 = vmul.f32 0.06666667, %v2096_v7  ;;  %v2143_v20 = vadd.f32 %v2138_v11, %v2095_v60  ;;  %v2144_v22 = vadd.f32 %v2139_v16, %v2096_v7 }
 0x4e6   : > { %v2120_v19 = vmul.f32 0.53333336, %v2095_v60  ;;  %v2121_v21 = vmul.f32 0.53333336, %v2096_v7 }
 0x4e7   : > { %v2099_v23 = vadd.f32 %v2097_v17, %v2091_v52  ;;  %v2100_v24 = vadd.f32 %v2098_v18, %v2092_v12  ;;  %v2478_v15 = vpack.c.bf16 %v2143_v20, %v2143_v20  ;;  %v2479_v28 = vpack.c.bf16 %v2144_v22, %v2144_v22 }
 0x4e8   : > { %v2122_v25 = vadd.f32 %v2120_v19, %v2115_v13  ;;  %v2123_v27 = vadd.f32 %v2121_v21, %v2116_v14 }
 0x4e9   : > { %v2474_v29 = vpack.c.bf16 %v2099_v23, %v2099_v23  ;;  %v2475_v30 = vpack.c.bf16 %v2100_v24, %v2100_v24  ;;  %2434 = vst.msk [vmem:[%s3394_s8 + $0x78] sm:$0xf] %vm1803_vm1, %v2478_v15  ;;  %2435 = vst.msk [vmem:[%s3394_s8 + $0x7c] sm:$0xf] %vm1803_vm1, %v2479_v28 }
 0x4ea   : > { %v2476_v32 = vpack.c.bf16 %v2122_v25, %v2122_v25  ;;  %v2477_v1 = vpack.c.bf16 %v2123_v27, %v2123_v27 }
 0x4eb   : > { %2426 = vst.msk [vmem:[%s3394_s8 + $0x68] sm:$0xf] %vm1803_vm1, %v2474_v29  ;;  %2427 = vst.msk [vmem:[%s3394_s8 + $0x6c] sm:$0xf] %vm1803_vm1, %v2475_v30 }
 0x4ec   : > { %2430 = vst.msk [vmem:[%s3394_s8 + $0x70] sm:$0xf] %vm1803_vm1, %v2476_v32  ;;  %2431 = vst.msk [vmem:[%s3394_s8 + $0x74] sm:$0xf] %vm1803_vm1, %v2477_v1 }
 0x4ed   : > { %2822 = shalt.err (!%p2819_p5)
}
 0x4ee   : > { %s2823_s20 = scalar_lea.hbm %s3461_s14, 2048  ;;  %s2827_s30 = scalar_lea.hbm %s3529_s6, 4096 }
 0x4ef   : > { %p2824_p6 = scmp.ne.s32.totalorder %s3461_s14, %s2823_s20  ;;  %p2828_p10 = scmp.lt.u32.totalorder %s3461_s14, %s3529_s6 }
 0x4f0   : > { %p2829_p11 = scmp.lt.u32.totalorder %s2827_s30, %s2823_s20  ;;  %p2831_p13 = scmp.lt.u32.totalorder %s2823_s20, %s3461_s14 }
 0x4f1   : > { %p2825_p7 = pnand %p2824_p6, %p2973_p4 }
 0x4f2   : > { %p2830_p12 = por %p2829_p11, %p2828_p10 }
 0x4f3   : > { %p2826_p9 = pneg %p2825_p7 }
 0x4f4   : > { %p2832_p0 = por %p2831_p13, %p2830_p12 }
 0x4f6   : > { %p2833_p1 = pnand %p2832_p0, %p2826_p9 }
 0x4f8   : > { %2836 = shalt.err (!%p2833_p1)
}
 0x4f9   : > { %s2896_s13 = smov 64   ;;  %s2897_s24 = smov 4  }
 0x4fa   : > { %2724 = dma.vmem_to_hbm [thread:$0]  (%p2973_p4), %s3463_s12, 2048, %s3461_s14, %s3477_s15, %s2896_s13, %s2896_s13, %s2897_s24  }
 0x4fb PF: > { %p2730_p2 = scmp.ge.s32.totalorder %s2887_s26, 2  ;;  %s2186_s16 = sand.u32 1, %s2867_s21  }
 0x4fc   : > { %s2187_s17 = scalar_lea.sflag [#allocation5], %s2186_s16 }
 0x4fd   : > { %p2727_p3 = pnand %p2730_p2, %p2980_p8 }
 0x4ff   : > { %2862 = dma.done.wait (!%p2727_p3), %s2187_s17, 2048  }
 0x500   : > { %2864 = vsyncadd (!%p2727_p3), %s2187_s17, 4294965248  ;;  %s19_s26 = sadd.s32 1, %s2887_s26   ;;  %s3538_s21 = smov %s2871_s22 }
 0x501   : > { %p16_p5 = scmp.ge.s32.totalorder %s19_s26, 4   ;;  %s3539_s22 = smov %s2875_s23 }
 0x502   : > { %s3540_s23 = smov %s2986_s10  ;;  %s3541_s24 = smov %s2883_s25 }
 0x503   : > { %s3542_s25 = smov %s3544_s29  ;;  %18 = sbr.rel (!%p16_p5) target bundleno = 4 (0x4), region = 115 }
 0x50a   :  { %2192 = vsyncpa [#allocation5], 1 }
 0x50b   :  { %2194 = vsyncpa [#allocation5 + $0x1], 1 }

</bundles_post_ra>
